<compile_context>
chip_gen: v5e
topology: v5e:2x2
jax: 0.10.0
libtpu: 0.0.40
codegen_flags: <defaults>
</compile_context>

<pallas_src>
import jax
import jax.numpy as jnp
from jax.experimental import pallas as pl
from jax.experimental.pallas import tpu as pltpu

# --- small, tile-friendly stand-ins for the module's hyperparameters ---------
B = 2            # batch
T = 8            # sequence length
V = 32           # n_vocab (module: len(words) + 2)
PAD = V - 1      # padding_idx (module: len(words) + 1 == n_vocab - 1)
DW = 128         # embedding dim (module: 300) -- shrunk, lane-aligned
DH = 64          # hidden dim    (module: 50)  -- shrunk
NC = 4           # number of classes

# padded (lane/sublane-dense) kernel shapes
DHP = 128        # hidden dim padded to lane width
NCP = 128        # class dim padded to lane width (sliced to NC in wrapper)
B_PAD = 8        # batch padded to f32 sublane height


def rnn_kernel(ids_ref, p_ref, whh_ref, bias_ref, wout_ref, bout_ref,
               y_ref, xin_ref):
    """Single-program kernel.

    ids_ref : [T, B_PAD] int32  (SMEM)  time-major token ids
    p_ref   : [V, DHP]   f32    (VMEM)  precomputed emb @ W_ih, lane-padded
    whh_ref : [DHP, DHP] f32    (VMEM)  recurrent weights, zero-padded
    bias_ref: [1, DHP]   f32    (VMEM)  b_ih + b_hh, zero-padded
    wout_ref: [DHP, NCP] f32    (VMEM)  output Linear weight, zero-padded
    bout_ref: [1, NCP]   f32    (VMEM)  output Linear bias, zero-padded
    y_ref   : [B_PAD, NCP] f32  (VMEM)  lane-dense logits (slice [:B,:NC] outside)
    xin_ref : [T, B_PAD, DHP] f32 scratch -- per-token hoisted input term
    """
    n_t, n_b = ids_ref.shape

    # Hoist small operands into vregs once (avoid re-loading inside loops).
    bias = bias_ref[...]                       # [1, DHP]
    whh = whh_ref[...]                         # [DHP, DHP]

    # --- 1) Input path, hoisted off the critical path ------------------------
    # Gather the projected-embedding row for every (t, b) token and fold in the
    # combined bias. Ids come from SMEM scalars; rows come via pl.ds slices
    # (no per-step one-hot matmul on the recurrence path).
    for t in range(n_t):
        for b in range(n_b):
            idx = ids_ref[t, b]
            xin_ref[t, pl.ds(b, 1), :] = p_ref[pl.ds(idx, 1), :] + bias

    # --- 2) Recurrence: h_t = tanh(Xin[t] + h_{t-1} @ W_hh) ------------------
    # Fully unrolled (T is tiny and static); h stays in vregs.
    h = jnp.tanh(xin_ref[0])                   # h_0 = 0  =>  h_1 = tanh(x_1)
    for t in range(1, n_t):
        h = jnp.tanh(xin_ref[t]
                     + jnp.dot(h, whh, preferred_element_type=jnp.float32))

    # --- 3) Output head (lane-dense [B_PAD, NCP] store) ----------------------
    y_ref[...] = (jnp.dot(h, wout_ref[...], preferred_element_type=jnp.float32)
                  + bout_ref[...])


def rnn_forward(x_ids, params):
    """x_ids: [B, T] int32 token ids (batch_first, like the PyTorch module)."""
    emb, wih, whh, bih, bhh, wout, bout = params
    b, t = x_ids.shape

    # One-time hoist: fold the input projection through the embedding table and
    # both RNN biases into a single per-token additive term.
    p = jnp.dot(emb, wih)                              # [V, DH]
    bias = bih + bhh                                   # [1, DH]

    # Zero-pad to lane-dense shapes (padded rows/cols are zero => math unchanged).
    p_pad = jnp.zeros((V, DHP), jnp.float32).at[:, :DH].set(p)
    whh_pad = jnp.zeros((DHP, DHP), jnp.float32).at[:DH, :DH].set(whh)
    bias_pad = jnp.zeros((1, DHP), jnp.float32).at[:, :DH].set(bias)
    wout_pad = jnp.zeros((DHP, NCP), jnp.float32).at[:DH, :NC].set(wout)
    bout_pad = jnp.zeros((1, NCP), jnp.float32).at[:, :NC].set(bout)

    # Ids: time-major int32 for SMEM; pad batch with PAD tokens (zero embedding
    # row => padded batch rows are harmless and sliced off below). Clamp guards
    # the in-kernel pl.ds row gather against out-of-range ids.
    ids = jnp.clip(x_ids.astype(jnp.int32), 0, V - 1)
    ids_pad = jnp.full((t, B_PAD), PAD, jnp.int32).at[:, :b].set(ids.T)

    smem = pl.BlockSpec(memory_space=pltpu.MemorySpace.SMEM)
    vmem = pl.BlockSpec(memory_space=pltpu.MemorySpace.VMEM)

    cost = pl.CostEstimate(
        flops=2 * t * B_PAD * DHP * DHP + 2 * B_PAD * DHP * NCP,
        transcendentals=t * B_PAD * DHP,
        bytes_accessed=4 * (V * DHP + DHP * DHP + DHP + DHP * NCP + NCP
                            + B_PAD * NCP) + 4 * t * B_PAD,
    )

    # TODO(synk): for real module sizes (n_vocab ~ tens of thousands) keep the
    # projected table in HBM (memory_space=pl.ANY) and DMA only the T*B needed
    # rows instead of staging the whole table in VMEM (v7x has 64 MiB VMEM).
    y_pad = pl.pallas_call(
        rnn_kernel,
        out_shape=jax.ShapeDtypeStruct((B_PAD, NCP), jnp.float32),
        in_specs=[smem, vmem, vmem, vmem, vmem, vmem],
        out_specs=vmem,
        scratch_shapes=[pltpu.VMEM((t, B_PAD, DHP), jnp.float32)],
        cost_estimate=cost,
    )(ids_pad, p_pad, whh_pad, bias_pad, wout_pad, bout_pad)

    return y_pad[:b, :NC]


def init_params(key):
    """Deterministic parameter init mirroring the module's shapes."""
    k = jax.random.split(key, 7)
    emb = jax.random.normal(k[0], (V, DW), jnp.float32) * 0.1
    emb = emb.at[PAD].set(0.0)                       # padding_idx row is zero
    s = 1.0 / jnp.sqrt(jnp.float32(DH))
    wih = jax.random.uniform(k[1], (DW, DH), jnp.float32, -s, s)
    whh = jax.random.uniform(k[2], (DH, DH), jnp.float32, -s, s)
    bih = jax.random.uniform(k[3], (1, DH), jnp.float32, -s, s)
    bhh = jax.random.uniform(k[4], (1, DH), jnp.float32, -s, s)
    wout = jax.random.uniform(k[5], (DH, NC), jnp.float32, -s, s)
    bout = jax.random.uniform(k[6], (1, NC), jnp.float32, -s, s)
    return emb, wih, whh, bih, bhh, wout, bout


def rnn_forward_ref(x_ids, params):
    """Pure-JAX reference (same math) for a correctness sanity check."""
    emb, wih, whh, bih, bhh, wout, bout = params
    x = jnp.take(emb, x_ids, axis=0)                                # [B, T, DW]

    def step(h, x_t):
        h = jnp.tanh(x_t @ wih + bih + h @ whh + bhh)
        return h, h

    h0 = jnp.zeros((x_ids.shape[0], DH), jnp.float32)
    h_last, _ = jax.lax.scan(step, h0, jnp.swapaxes(x, 0, 1))       # scan over T
    return h_last @ wout + bout


if __name__ == "__main__":
    key = jax.random.PRNGKey(0)
    kp, kx = jax.random.split(key)
    params = init_params(kp)
    x_ids = jax.random.randint(kx, (B, T), 0, V, dtype=jnp.int32)
    x_ids = x_ids.at[0, -2:].set(PAD)   # include some padding tokens

    y = rnn_forward(x_ids, params)
    jax.block_until_ready(y)

    y_ref = rnn_forward_ref(x_ids, params)
    assert y.shape == (B, NC)
    assert jnp.allclose(y, y_ref, atol=1e-4, rtol=1e-4)

    print("KERNEL_OK")
</pallas_src>

<mosaic_0001>
module attributes {stable_mosaic.version = 11 : i64} {
  func.func @rnn_kernel(%arg0: memref<8x8xi32, #tpu.memory_space<smem>>, %arg1: memref<32x128xf32, #tpu.memory_space<vmem>>, %arg2: memref<128x128xf32, #tpu.memory_space<vmem>>, %arg3: memref<1x128xf32, #tpu.memory_space<vmem>>, %arg4: memref<128x128xf32, #tpu.memory_space<vmem>>, %arg5: memref<1x128xf32, #tpu.memory_space<vmem>>, %arg6: memref<8x128xf32, #tpu.memory_space<vmem>>, %arg7: memref<8x8x128xf32, #tpu.memory_space<vmem>>) attributes {dimension_semantics = [], scalar_prefetch = 0 : i64, scratch_operands = 1 : i64, tpu.core_type = #tpu.core_type<tc>} {
    %c0 = arith.constant 0 : index
    %c0_0 = arith.constant 0 : index
    %0 = vector.load %arg3[%c0, %c0_0] : memref<1x128xf32, #tpu.memory_space<vmem>>, vector<1x128xf32>
    %c0_1 = arith.constant 0 : index
    %c0_2 = arith.constant 0 : index
    %1 = vector.load %arg2[%c0_1, %c0_2] : memref<128x128xf32, #tpu.memory_space<vmem>>, vector<128x128xf32>
    %c0_3 = arith.constant 0 : index
    %c0_4 = arith.constant 0 : index
    %2 = memref.load %arg0[%c0_3, %c0_4] : memref<8x8xi32, #tpu.memory_space<smem>>
    %3 = arith.index_cast %2 : i32 to index
    %c0_5 = arith.constant 0 : index
    %4 = vector.load %arg1[%3, %c0_5] : memref<32x128xf32, #tpu.memory_space<vmem>>, vector<1x128xf32>
    %5 = arith.addf %4, %0 : vector<1x128xf32>
    %c0_6 = arith.constant 0 : index
    %c0_7 = arith.constant 0 : index
    %c0_8 = arith.constant 0 : index
    %6 = vector.load %arg7[%c0_6, %c0_7, %c0_8] : memref<8x8x128xf32, #tpu.memory_space<vmem>>, vector<1x1x128xf32>
    %7 = vector.shape_cast %6 : vector<1x1x128xf32> to vector<1x128xf32>
    %8 = vector.shape_cast %5 : vector<1x128xf32> to vector<1x1x128xf32>
    tpu.vector_store %arg7[%c0_6, %c0_7, %c0_8], %8 {strides = array<i32>} : memref<8x8x128xf32, #tpu.memory_space<vmem>>, vector<1x1x128xf32>,
    %c0_9 = arith.constant 0 : index
    %c1 = arith.constant 1 : index
    %9 = memref.load %arg0[%c0_9, %c1] : memref<8x8xi32, #tpu.memory_space<smem>>
    %10 = arith.index_cast %9 : i32 to index
    %c0_10 = arith.constant 0 : index
    %11 = vector.load %arg1[%10, %c0_10] : memref<32x128xf32, #tpu.memory_space<vmem>>, vector<1x128xf32>
    %12 = arith.addf %11, %0 : vector<1x128xf32>
    %c0_11 = arith.constant 0 : index
    %c1_12 = arith.constant 1 : index
    %c0_13 = arith.constant 0 : index
    %13 = vector.load %arg7[%c0_11, %c1_12, %c0_13] : memref<8x8x128xf32, #tpu.memory_space<vmem>>, vector<1x1x128xf32>
    %14 = vector.shape_cast %13 : vector<1x1x128xf32> to vector<1x128xf32>
    %15 = vector.shape_cast %12 : vector<1x128xf32> to vector<1x1x128xf32>
    tpu.vector_store %arg7[%c0_11, %c1_12, %c0_13], %15 {strides = array<i32>} : memref<8x8x128xf32, #tpu.memory_space<vmem>>, vector<1x1x128xf32>,
    %c0_14 = arith.constant 0 : index
    %c2 = arith.constant 2 : index
    %16 = memref.load %arg0[%c0_14, %c2] : memref<8x8xi32, #tpu.memory_space<smem>>
    %17 = arith.index_cast %16 : i32 to index
    %c0_15 = arith.constant 0 : index
    %18 = vector.load %arg1[%17, %c0_15] : memref<32x128xf32, #tpu.memory_space<vmem>>, vector<1x128xf32>
    %19 = arith.addf %18, %0 : vector<1x128xf32>
    %c0_16 = arith.constant 0 : index
    %c2_17 = arith.constant 2 : index
    %c0_18 = arith.constant 0 : index
    %20 = vector.load %arg7[%c0_16, %c2_17, %c0_18] : memref<8x8x128xf32, #tpu.memory_space<vmem>>, vector<1x1x128xf32>
    %21 = vector.shape_cast %20 : vector<1x1x128xf32> to vector<1x128xf32>
    %22 = vector.shape_cast %19 : vector<1x128xf32> to vector<1x1x128xf32>
    tpu.vector_store %arg7[%c0_16, %c2_17, %c0_18], %22 {strides = array<i32>} : memref<8x8x128xf32, #tpu.memory_space<vmem>>, vector<1x1x128xf32>,
    %c0_19 = arith.constant 0 : index
    %c3 = arith.constant 3 : index
    %23 = memref.load %arg0[%c0_19, %c3] : memref<8x8xi32, #tpu.memory_space<smem>>
    %24 = arith.index_cast %23 : i32 to index
    %c0_20 = arith.constant 0 : index
    %25 = vector.load %arg1[%24, %c0_20] : memref<32x128xf32, #tpu.memory_space<vmem>>, vector<1x128xf32>
    %26 = arith.addf %25, %0 : vector<1x128xf32>
    %c0_21 = arith.constant 0 : index
    %c3_22 = arith.constant 3 : index
    %c0_23 = arith.constant 0 : index
    %27 = vector.load %arg7[%c0_21, %c3_22, %c0_23] : memref<8x8x128xf32, #tpu.memory_space<vmem>>, vector<1x1x128xf32>
    %28 = vector.shape_cast %27 : vector<1x1x128xf32> to vector<1x128xf32>
    %29 = vector.shape_cast %26 : vector<1x128xf32> to vector<1x1x128xf32>
    tpu.vector_store %arg7[%c0_21, %c3_22, %c0_23], %29 {strides = array<i32>} : memref<8x8x128xf32, #tpu.memory_space<vmem>>, vector<1x1x128xf32>,
    %c0_24 = arith.constant 0 : index
    %c4 = arith.constant 4 : index
    %30 = memref.load %arg0[%c0_24, %c4] : memref<8x8xi32, #tpu.memory_space<smem>>
    %31 = arith.index_cast %30 : i32 to index
    %c0_25 = arith.constant 0 : index
    %32 = vector.load %arg1[%31, %c0_25] : memref<32x128xf32, #tpu.memory_space<vmem>>, vector<1x128xf32>
    %33 = arith.addf %32, %0 : vector<1x128xf32>
    %c0_26 = arith.constant 0 : index
    %c4_27 = arith.constant 4 : index
    %c0_28 = arith.constant 0 : index
    %34 = vector.load %arg7[%c0_26, %c4_27, %c0_28] : memref<8x8x128xf32, #tpu.memory_space<vmem>>, vector<1x1x128xf32>
    %35 = vector.shape_cast %34 : vector<1x1x128xf32> to vector<1x128xf32>
    %36 = vector.shape_cast %33 : vector<1x128xf32> to vector<1x1x128xf32>
    tpu.vector_store %arg7[%c0_26, %c4_27, %c0_28], %36 {strides = array<i32>} : memref<8x8x128xf32, #tpu.memory_space<vmem>>, vector<1x1x128xf32>,
    %c0_29 = arith.constant 0 : index
    %c5 = arith.constant 5 : index
    %37 = memref.load %arg0[%c0_29, %c5] : memref<8x8xi32, #tpu.memory_space<smem>>
    %38 = arith.index_cast %37 : i32 to index
    %c0_30 = arith.constant 0 : index
    %39 = vector.load %arg1[%38, %c0_30] : memref<32x128xf32, #tpu.memory_space<vmem>>, vector<1x128xf32>
    %40 = arith.addf %39, %0 : vector<1x128xf32>
    %c0_31 = arith.constant 0 : index
    %c5_32 = arith.constant 5 : index
    %c0_33 = arith.constant 0 : index
    %41 = vector.load %arg7[%c0_31, %c5_32, %c0_33] : memref<8x8x128xf32, #tpu.memory_space<vmem>>, vector<1x1x128xf32>
    %42 = vector.shape_cast %41 : vector<1x1x128xf32> to vector<1x128xf32>
    %43 = vector.shape_cast %40 : vector<1x128xf32> to vector<1x1x128xf32>
    tpu.vector_store %arg7[%c0_31, %c5_32, %c0_33], %43 {strides = array<i32>} : memref<8x8x128xf32, #tpu.memory_space<vmem>>, vector<1x1x128xf32>,
    %c0_34 = arith.constant 0 : index
    %c6 = arith.constant 6 : index
    %44 = memref.load %arg0[%c0_34, %c6] : memref<8x8xi32, #tpu.memory_space<smem>>
    %45 = arith.index_cast %44 : i32 to index
    %c0_35 = arith.constant 0 : index
    %46 = vector.load %arg1[%45, %c0_35] : memref<32x128xf32, #tpu.memory_space<vmem>>, vector<1x128xf32>
    %47 = arith.addf %46, %0 : vector<1x128xf32>
    %c0_36 = arith.constant 0 : index
    %c6_37 = arith.constant 6 : index
    %c0_38 = arith.constant 0 : index
    %48 = vector.load %arg7[%c0_36, %c6_37, %c0_38] : memref<8x8x128xf32, #tpu.memory_space<vmem>>, vector<1x1x128xf32>
    %49 = vector.shape_cast %48 : vector<1x1x128xf32> to vector<1x128xf32>
    %50 = vector.shape_cast %47 : vector<1x128xf32> to vector<1x1x128xf32>
    tpu.vector_store %arg7[%c0_36, %c6_37, %c0_38], %50 {strides = array<i32>} : memref<8x8x128xf32, #tpu.memory_space<vmem>>, vector<1x1x128xf32>,
    %c0_39 = arith.constant 0 : index
    %c7 = arith.constant 7 : index
    %51 = memref.load %arg0[%c0_39, %c7] : memref<8x8xi32, #tpu.memory_space<smem>>
    %52 = arith.index_cast %51 : i32 to index
    %c0_40 = arith.constant 0 : index
    %53 = vector.load %arg1[%52, %c0_40] : memref<32x128xf32, #tpu.memory_space<vmem>>, vector<1x128xf32>
    %54 = arith.addf %53, %0 : vector<1x128xf32>
    %c0_41 = arith.constant 0 : index
    %c7_42 = arith.constant 7 : index
    %c0_43 = arith.constant 0 : index
    %55 = vector.load %arg7[%c0_41, %c7_42, %c0_43] : memref<8x8x128xf32, #tpu.memory_space<vmem>>, vector<1x1x128xf32>
    %56 = vector.shape_cast %55 : vector<1x1x128xf32> to vector<1x128xf32>
    %57 = vector.shape_cast %54 : vector<1x128xf32> to vector<1x1x128xf32>
    tpu.vector_store %arg7[%c0_41, %c7_42, %c0_43], %57 {strides = array<i32>} : memref<8x8x128xf32, #tpu.memory_space<vmem>>, vector<1x1x128xf32>,
    %c1_44 = arith.constant 1 : index
    %c0_45 = arith.constant 0 : index
    %58 = memref.load %arg0[%c1_44, %c0_45] : memref<8x8xi32, #tpu.memory_space<smem>>
    %59 = arith.index_cast %58 : i32 to index
    %c0_46 = arith.constant 0 : index
    %60 = vector.load %arg1[%59, %c0_46] : memref<32x128xf32, #tpu.memory_space<vmem>>, vector<1x128xf32>
    %61 = arith.addf %60, %0 : vector<1x128xf32>
    %c1_47 = arith.constant 1 : index
    %c0_48 = arith.constant 0 : index
    %c0_49 = arith.constant 0 : index
    %62 = vector.load %arg7[%c1_47, %c0_48, %c0_49] : memref<8x8x128xf32, #tpu.memory_space<vmem>>, vector<1x1x128xf32>
    %63 = vector.shape_cast %62 : vector<1x1x128xf32> to vector<1x128xf32>
    %64 = vector.shape_cast %61 : vector<1x128xf32> to vector<1x1x128xf32>
    tpu.vector_store %arg7[%c1_47, %c0_48, %c0_49], %64 {strides = array<i32>} : memref<8x8x128xf32, #tpu.memory_space<vmem>>, vector<1x1x128xf32>,
    %c1_50 = arith.constant 1 : index
    %c1_51 = arith.constant 1 : index
    %65 = memref.load %arg0[%c1_50, %c1_51] : memref<8x8xi32, #tpu.memory_space<smem>>
    %66 = arith.index_cast %65 : i32 to index
    %c0_52 = arith.constant 0 : index
    %67 = vector.load %arg1[%66, %c0_52] : memref<32x128xf32, #tpu.memory_space<vmem>>, vector<1x128xf32>
    %68 = arith.addf %67, %0 : vector<1x128xf32>
    %c1_53 = arith.constant 1 : index
    %c1_54 = arith.constant 1 : index
    %c0_55 = arith.constant 0 : index
    %69 = vector.load %arg7[%c1_53, %c1_54, %c0_55] : memref<8x8x128xf32, #tpu.memory_space<vmem>>, vector<1x1x128xf32>
    %70 = vector.shape_cast %69 : vector<1x1x128xf32> to vector<1x128xf32>
    %71 = vector.shape_cast %68 : vector<1x128xf32> to vector<1x1x128xf32>
    tpu.vector_store %arg7[%c1_53, %c1_54, %c0_55], %71 {strides = array<i32>} : memref<8x8x128xf32, #tpu.memory_space<vmem>>, vector<1x1x128xf32>,
    %c1_56 = arith.constant 1 : index
    %c2_57 = arith.constant 2 : index
    %72 = memref.load %arg0[%c1_56, %c2_57] : memref<8x8xi32, #tpu.memory_space<smem>>
    %73 = arith.index_cast %72 : i32 to index
    %c0_58 = arith.constant 0 : index
    %74 = vector.load %arg1[%73, %c0_58] : memref<32x128xf32, #tpu.memory_space<vmem>>, vector<1x128xf32>
    %75 = arith.addf %74, %0 : vector<1x128xf32>
    %c1_59 = arith.constant 1 : index
    %c2_60 = arith.constant 2 : index
    %c0_61 = arith.constant 0 : index
    %76 = vector.load %arg7[%c1_59, %c2_60, %c0_61] : memref<8x8x128xf32, #tpu.memory_space<vmem>>, vector<1x1x128xf32>
    %77 = vector.shape_cast %76 : vector<1x1x128xf32> to vector<1x128xf32>
    %78 = vector.shape_cast %75 : vector<1x128xf32> to vector<1x1x128xf32>
    tpu.vector_store %arg7[%c1_59, %c2_60, %c0_61], %78 {strides = array<i32>} : memref<8x8x128xf32, #tpu.memory_space<vmem>>, vector<1x1x128xf32>,
    %c1_62 = arith.constant 1 : index
    %c3_63 = arith.constant 3 : index
    %79 = memref.load %arg0[%c1_62, %c3_63] : memref<8x8xi32, #tpu.memory_space<smem>>
    %80 = arith.index_cast %79 : i32 to index
    %c0_64 = arith.constant 0 : index
    %81 = vector.load %arg1[%80, %c0_64] : memref<32x128xf32, #tpu.memory_space<vmem>>, vector<1x128xf32>
    %82 = arith.addf %81, %0 : vector<1x128xf32>
    %c1_65 = arith.constant 1 : index
    %c3_66 = arith.constant 3 : index
    %c0_67 = arith.constant 0 : index
    %83 = vector.load %arg7[%c1_65, %c3_66, %c0_67] : memref<8x8x128xf32, #tpu.memory_space<vmem>>, vector<1x1x128xf32>
    %84 = vector.shape_cast %83 : vector<1x1x128xf32> to vector<1x128xf32>
    %85 = vector.shape_cast %82 : vector<1x128xf32> to vector<1x1x128xf32>
    tpu.vector_store %arg7[%c1_65, %c3_66, %c0_67], %85 {strides = array<i32>} : memref<8x8x128xf32, #tpu.memory_space<vmem>>, vector<1x1x128xf32>,
    %c1_68 = arith.constant 1 : index
    %c4_69 = arith.constant 4 : index
    %86 = memref.load %arg0[%c1_68, %c4_69] : memref<8x8xi32, #tpu.memory_space<smem>>
    %87 = arith.index_cast %86 : i32 to index
    %c0_70 = arith.constant 0 : index
    %88 = vector.load %arg1[%87, %c0_70] : memref<32x128xf32, #tpu.memory_space<vmem>>, vector<1x128xf32>
    %89 = arith.addf %88, %0 : vector<1x128xf32>
    %c1_71 = arith.constant 1 : index
    %c4_72 = arith.constant 4 : index
    %c0_73 = arith.constant 0 : index
    %90 = vector.load %arg7[%c1_71, %c4_72, %c0_73] : memref<8x8x128xf32, #tpu.memory_space<vmem>>, vector<1x1x128xf32>
    %91 = vector.shape_cast %90 : vector<1x1x128xf32> to vector<1x128xf32>
    %92 = vector.shape_cast %89 : vector<1x128xf32> to vector<1x1x128xf32>
    tpu.vector_store %arg7[%c1_71, %c4_72, %c0_73], %92 {strides = array<i32>} : memref<8x8x128xf32, #tpu.memory_space<vmem>>, vector<1x1x128xf32>,
    %c1_74 = arith.constant 1 : index
    %c5_75 = arith.constant 5 : index
    %93 = memref.load %arg0[%c1_74, %c5_75] : memref<8x8xi32, #tpu.memory_space<smem>>
    %94 = arith.index_cast %93 : i32 to index
    %c0_76 = arith.constant 0 : index
    %95 = vector.load %arg1[%94, %c0_76] : memref<32x128xf32, #tpu.memory_space<vmem>>, vector<1x128xf32>
    %96 = arith.addf %95, %0 : vector<1x128xf32>
    %c1_77 = arith.constant 1 : index
    %c5_78 = arith.constant 5 : index
    %c0_79 = arith.constant 0 : index
    %97 = vector.load %arg7[%c1_77, %c5_78, %c0_79] : memref<8x8x128xf32, #tpu.memory_space<vmem>>, vector<1x1x128xf32>
    %98 = vector.shape_cast %97 : vector<1x1x128xf32> to vector<1x128xf32>
    %99 = vector.shape_cast %96 : vector<1x128xf32> to vector<1x1x128xf32>
    tpu.vector_store %arg7[%c1_77, %c5_78, %c0_79], %99 {strides = array<i32>} : memref<8x8x128xf32, #tpu.memory_space<vmem>>, vector<1x1x128xf32>,
    %c1_80 = arith.constant 1 : index
    %c6_81 = arith.constant 6 : index
    %100 = memref.load %arg0[%c1_80, %c6_81] : memref<8x8xi32, #tpu.memory_space<smem>>
    %101 = arith.index_cast %100 : i32 to index
    %c0_82 = arith.constant 0 : index
    %102 = vector.load %arg1[%101, %c0_82] : memref<32x128xf32, #tpu.memory_space<vmem>>, vector<1x128xf32>
    %103 = arith.addf %102, %0 : vector<1x128xf32>
    %c1_83 = arith.constant 1 : index
    %c6_84 = arith.constant 6 : index
    %c0_85 = arith.constant 0 : index
    %104 = vector.load %arg7[%c1_83, %c6_84, %c0_85] : memref<8x8x128xf32, #tpu.memory_space<vmem>>, vector<1x1x128xf32>
    %105 = vector.shape_cast %104 : vector<1x1x128xf32> to vector<1x128xf32>
    %106 = vector.shape_cast %103 : vector<1x128xf32> to vector<1x1x128xf32>
    tpu.vector_store %arg7[%c1_83, %c6_84, %c0_85], %106 {strides = array<i32>} : memref<8x8x128xf32, #tpu.memory_space<vmem>>, vector<1x1x128xf32>,
    %c1_86 = arith.constant 1 : index
    %c7_87 = arith.constant 7 : index
    %107 = memref.load %arg0[%c1_86, %c7_87] : memref<8x8xi32, #tpu.memory_space<smem>>
    %108 = arith.index_cast %107 : i32 to index
    %c0_88 = arith.constant 0 : index
    %109 = vector.load %arg1[%108, %c0_88] : memref<32x128xf32, #tpu.memory_space<vmem>>, vector<1x128xf32>
    %110 = arith.addf %109, %0 : vector<1x128xf32>
    %c1_89 = arith.constant 1 : index
    %c7_90 = arith.constant 7 : index
    %c0_91 = arith.constant 0 : index
    %111 = vector.load %arg7[%c1_89, %c7_90, %c0_91] : memref<8x8x128xf32, #tpu.memory_space<vmem>>, vector<1x1x128xf32>
    %112 = vector.shape_cast %111 : vector<1x1x128xf32> to vector<1x128xf32>
    %113 = vector.shape_cast %110 : vector<1x128xf32> to vector<1x1x128xf32>
    tpu.vector_store %arg7[%c1_89, %c7_90, %c0_91], %113 {strides = array<i32>} : memref<8x8x128xf32, #tpu.memory_space<vmem>>, vector<1x1x128xf32>,
    %c2_92 = arith.constant 2 : index
    %c0_93 = arith.constant 0 : index
    %114 = memref.load %arg0[%c2_92, %c0_93] : memref<8x8xi32, #tpu.memory_space<smem>>
    %115 = arith.index_cast %114 : i32 to index
    %c0_94 = arith.constant 0 : index
    %116 = vector.load %arg1[%115, %c0_94] : memref<32x128xf32, #tpu.memory_space<vmem>>, vector<1x128xf32>
    %117 = arith.addf %116, %0 : vector<1x128xf32>
    %c2_95 = arith.constant 2 : index
    %c0_96 = arith.constant 0 : index
    %c0_97 = arith.constant 0 : index
    %118 = vector.load %arg7[%c2_95, %c0_96, %c0_97] : memref<8x8x128xf32, #tpu.memory_space<vmem>>, vector<1x1x128xf32>
    %119 = vector.shape_cast %118 : vector<1x1x128xf32> to vector<1x128xf32>
    %120 = vector.shape_cast %117 : vector<1x128xf32> to vector<1x1x128xf32>
    tpu.vector_store %arg7[%c2_95, %c0_96, %c0_97], %120 {strides = array<i32>} : memref<8x8x128xf32, #tpu.memory_space<vmem>>, vector<1x1x128xf32>,
    %c2_98 = arith.constant 2 : index
    %c1_99 = arith.constant 1 : index
    %121 = memref.load %arg0[%c2_98, %c1_99] : memref<8x8xi32, #tpu.memory_space<smem>>
    %122 = arith.index_cast %121 : i32 to index
    %c0_100 = arith.constant 0 : index
    %123 = vector.load %arg1[%122, %c0_100] : memref<32x128xf32, #tpu.memory_space<vmem>>, vector<1x128xf32>
    %124 = arith.addf %123, %0 : vector<1x128xf32>
    %c2_101 = arith.constant 2 : index
    %c1_102 = arith.constant 1 : index
    %c0_103 = arith.constant 0 : index
    %125 = vector.load %arg7[%c2_101, %c1_102, %c0_103] : memref<8x8x128xf32, #tpu.memory_space<vmem>>, vector<1x1x128xf32>
    %126 = vector.shape_cast %125 : vector<1x1x128xf32> to vector<1x128xf32>
    %127 = vector.shape_cast %124 : vector<1x128xf32> to vector<1x1x128xf32>
    tpu.vector_store %arg7[%c2_101, %c1_102, %c0_103], %127 {strides = array<i32>} : memref<8x8x128xf32, #tpu.memory_space<vmem>>, vector<1x1x128xf32>,
    %c2_104 = arith.constant 2 : index
    %c2_105 = arith.constant 2 : index
    %128 = memref.load %arg0[%c2_104, %c2_105] : memref<8x8xi32, #tpu.memory_space<smem>>
    %129 = arith.index_cast %128 : i32 to index
    %c0_106 = arith.constant 0 : index
    %130 = vector.load %arg1[%129, %c0_106] : memref<32x128xf32, #tpu.memory_space<vmem>>, vector<1x128xf32>
    %131 = arith.addf %130, %0 : vector<1x128xf32>
    %c2_107 = arith.constant 2 : index
    %c2_108 = arith.constant 2 : index
    %c0_109 = arith.constant 0 : index
    %132 = vector.load %arg7[%c2_107, %c2_108, %c0_109] : memref<8x8x128xf32, #tpu.memory_space<vmem>>, vector<1x1x128xf32>
    %133 = vector.shape_cast %132 : vector<1x1x128xf32> to vector<1x128xf32>
    %134 = vector.shape_cast %131 : vector<1x128xf32> to vector<1x1x128xf32>
    tpu.vector_store %arg7[%c2_107, %c2_108, %c0_109], %134 {strides = array<i32>} : memref<8x8x128xf32, #tpu.memory_space<vmem>>, vector<1x1x128xf32>,
    %c2_110 = arith.constant 2 : index
    %c3_111 = arith.constant 3 : index
    %135 = memref.load %arg0[%c2_110, %c3_111] : memref<8x8xi32, #tpu.memory_space<smem>>
    %136 = arith.index_cast %135 : i32 to index
    %c0_112 = arith.constant 0 : index
    %137 = vector.load %arg1[%136, %c0_112] : memref<32x128xf32, #tpu.memory_space<vmem>>, vector<1x128xf32>
    %138 = arith.addf %137, %0 : vector<1x128xf32>
    %c2_113 = arith.constant 2 : index
    %c3_114 = arith.constant 3 : index
    %c0_115 = arith.constant 0 : index
    %139 = vector.load %arg7[%c2_113, %c3_114, %c0_115] : memref<8x8x128xf32, #tpu.memory_space<vmem>>, vector<1x1x128xf32>
    %140 = vector.shape_cast %139 : vector<1x1x128xf32> to vector<1x128xf32>
    %141 = vector.shape_cast %138 : vector<1x128xf32> to vector<1x1x128xf32>
    tpu.vector_store %arg7[%c2_113, %c3_114, %c0_115], %141 {strides = array<i32>} : memref<8x8x128xf32, #tpu.memory_space<vmem>>, vector<1x1x128xf32>,
    %c2_116 = arith.constant 2 : index
    %c4_117 = arith.constant 4 : index
    %142 = memref.load %arg0[%c2_116, %c4_117] : memref<8x8xi32, #tpu.memory_space<smem>>
    %143 = arith.index_cast %142 : i32 to index
    %c0_118 = arith.constant 0 : index
    %144 = vector.load %arg1[%143, %c0_118] : memref<32x128xf32, #tpu.memory_space<vmem>>, vector<1x128xf32>
    %145 = arith.addf %144, %0 : vector<1x128xf32>
    %c2_119 = arith.constant 2 : index
    %c4_120 = arith.constant 4 : index
    %c0_121 = arith.constant 0 : index
    %146 = vector.load %arg7[%c2_119, %c4_120, %c0_121] : memref<8x8x128xf32, #tpu.memory_space<vmem>>, vector<1x1x128xf32>
    %147 = vector.shape_cast %146 : vector<1x1x128xf32> to vector<1x128xf32>
    %148 = vector.shape_cast %145 : vector<1x128xf32> to vector<1x1x128xf32>
    tpu.vector_store %arg7[%c2_119, %c4_120, %c0_121], %148 {strides = array<i32>} : memref<8x8x128xf32, #tpu.memory_space<vmem>>, vector<1x1x128xf32>,
    %c2_122 = arith.constant 2 : index
    %c5_123 = arith.constant 5 : index
    %149 = memref.load %arg0[%c2_122, %c5_123] : memref<8x8xi32, #tpu.memory_space<smem>>
    %150 = arith.index_cast %149 : i32 to index
    %c0_124 = arith.constant 0 : index
    %151 = vector.load %arg1[%150, %c0_124] : memref<32x128xf32, #tpu.memory_space<vmem>>, vector<1x128xf32>
    %152 = arith.addf %151, %0 : vector<1x128xf32>
    %c2_125 = arith.constant 2 : index
    %c5_126 = arith.constant 5 : index
    %c0_127 = arith.constant 0 : index
    %153 = vector.load %arg7[%c2_125, %c5_126, %c0_127] : memref<8x8x128xf32, #tpu.memory_space<vmem>>, vector<1x1x128xf32>
    %154 = vector.shape_cast %153 : vector<1x1x128xf32> to vector<1x128xf32>
    %155 = vector.shape_cast %152 : vector<1x128xf32> to vector<1x1x128xf32>
    tpu.vector_store %arg7[%c2_125, %c5_126, %c0_127], %155 {strides = array<i32>} : memref<8x8x128xf32, #tpu.memory_space<vmem>>, vector<1x1x128xf32>,
    %c2_128 = arith.constant 2 : index
    %c6_129 = arith.constant 6 : index
    %156 = memref.load %arg0[%c2_128, %c6_129] : memref<8x8xi32, #tpu.memory_space<smem>>
    %157 = arith.index_cast %156 : i32 to index
    %c0_130 = arith.constant 0 : index
    %158 = vector.load %arg1[%157, %c0_130] : memref<32x128xf32, #tpu.memory_space<vmem>>, vector<1x128xf32>
    %159 = arith.addf %158, %0 : vector<1x128xf32>
    %c2_131 = arith.constant 2 : index
    %c6_132 = arith.constant 6 : index
    %c0_133 = arith.constant 0 : index
    %160 = vector.load %arg7[%c2_131, %c6_132, %c0_133] : memref<8x8x128xf32, #tpu.memory_space<vmem>>, vector<1x1x128xf32>
    %161 = vector.shape_cast %160 : vector<1x1x128xf32> to vector<1x128xf32>
    %162 = vector.shape_cast %159 : vector<1x128xf32> to vector<1x1x128xf32>
    tpu.vector_store %arg7[%c2_131, %c6_132, %c0_133], %162 {strides = array<i32>} : memref<8x8x128xf32, #tpu.memory_space<vmem>>, vector<1x1x128xf32>,
    %c2_134 = arith.constant 2 : index
    %c7_135 = arith.constant 7 : index
    %163 = memref.load %arg0[%c2_134, %c7_135] : memref<8x8xi32, #tpu.memory_space<smem>>
    %164 = arith.index_cast %163 : i32 to index
    %c0_136 = arith.constant 0 : index
    %165 = vector.load %arg1[%164, %c0_136] : memref<32x128xf32, #tpu.memory_space<vmem>>, vector<1x128xf32>
    %166 = arith.addf %165, %0 : vector<1x128xf32>
    %c2_137 = arith.constant 2 : index
    %c7_138 = arith.constant 7 : index
    %c0_139 = arith.constant 0 : index
    %167 = vector.load %arg7[%c2_137, %c7_138, %c0_139] : memref<8x8x128xf32, #tpu.memory_space<vmem>>, vector<1x1x128xf32>
    %168 = vector.shape_cast %167 : vector<1x1x128xf32> to vector<1x128xf32>
    %169 = vector.shape_cast %166 : vector<1x128xf32> to vector<1x1x128xf32>
    tpu.vector_store %arg7[%c2_137, %c7_138, %c0_139], %169 {strides = array<i32>} : memref<8x8x128xf32, #tpu.memory_space<vmem>>, vector<1x1x128xf32>,
    %c3_140 = arith.constant 3 : index
    %c0_141 = arith.constant 0 : index
    %170 = memref.load %arg0[%c3_140, %c0_141] : memref<8x8xi32, #tpu.memory_space<smem>>
    %171 = arith.index_cast %170 : i32 to index
    %c0_142 = arith.constant 0 : index
    %172 = vector.load %arg1[%171, %c0_142] : memref<32x128xf32, #tpu.memory_space<vmem>>, vector<1x128xf32>
    %173 = arith.addf %172, %0 : vector<1x128xf32>
    %c3_143 = arith.constant 3 : index
    %c0_144 = arith.constant 0 : index
    %c0_145 = arith.constant 0 : index
    %174 = vector.load %arg7[%c3_143, %c0_144, %c0_145] : memref<8x8x128xf32, #tpu.memory_space<vmem>>, vector<1x1x128xf32>
    %175 = vector.shape_cast %174 : vector<1x1x128xf32> to vector<1x128xf32>
    %176 = vector.shape_cast %173 : vector<1x128xf32> to vector<1x1x128xf32>
    tpu.vector_store %arg7[%c3_143, %c0_144, %c0_145], %176 {strides = array<i32>} : memref<8x8x128xf32, #tpu.memory_space<vmem>>, vector<1x1x128xf32>,
    %c3_146 = arith.constant 3 : index
    %c1_147 = arith.constant 1 : index
    %177 = memref.load %arg0[%c3_146, %c1_147] : memref<8x8xi32, #tpu.memory_space<smem>>
    %178 = arith.index_cast %177 : i32 to index
    %c0_148 = arith.constant 0 : index
    %179 = vector.load %arg1[%178, %c0_148] : memref<32x128xf32, #tpu.memory_space<vmem>>, vector<1x128xf32>
    %180 = arith.addf %179, %0 : vector<1x128xf32>
    %c3_149 = arith.constant 3 : index
    %c1_150 = arith.constant 1 : index
    %c0_151 = arith.constant 0 : index
    %181 = vector.load %arg7[%c3_149, %c1_150, %c0_151] : memref<8x8x128xf32, #tpu.memory_space<vmem>>, vector<1x1x128xf32>
    %182 = vector.shape_cast %181 : vector<1x1x128xf32> to vector<1x128xf32>
    %183 = vector.shape_cast %180 : vector<1x128xf32> to vector<1x1x128xf32>
    tpu.vector_store %arg7[%c3_149, %c1_150, %c0_151], %183 {strides = array<i32>} : memref<8x8x128xf32, #tpu.memory_space<vmem>>, vector<1x1x128xf32>,
    %c3_152 = arith.constant 3 : index
    %c2_153 = arith.constant 2 : index
    %184 = memref.load %arg0[%c3_152, %c2_153] : memref<8x8xi32, #tpu.memory_space<smem>>
    %185 = arith.index_cast %184 : i32 to index
    %c0_154 = arith.constant 0 : index
    %186 = vector.load %arg1[%185, %c0_154] : memref<32x128xf32, #tpu.memory_space<vmem>>, vector<1x128xf32>
    %187 = arith.addf %186, %0 : vector<1x128xf32>
    %c3_155 = arith.constant 3 : index
    %c2_156 = arith.constant 2 : index
    %c0_157 = arith.constant 0 : index
    %188 = vector.load %arg7[%c3_155, %c2_156, %c0_157] : memref<8x8x128xf32, #tpu.memory_space<vmem>>, vector<1x1x128xf32>
    %189 = vector.shape_cast %188 : vector<1x1x128xf32> to vector<1x128xf32>
    %190 = vector.shape_cast %187 : vector<1x128xf32> to vector<1x1x128xf32>
    tpu.vector_store %arg7[%c3_155, %c2_156, %c0_157], %190 {strides = array<i32>} : memref<8x8x128xf32, #tpu.memory_space<vmem>>, vector<1x1x128xf32>,
    %c3_158 = arith.constant 3 : index
    %c3_159 = arith.constant 3 : index
    %191 = memref.load %arg0[%c3_158, %c3_159] : memref<8x8xi32, #tpu.memory_space<smem>>
    %192 = arith.index_cast %191 : i32 to index
    %c0_160 = arith.constant 0 : index
    %193 = vector.load %arg1[%192, %c0_160] : memref<32x128xf32, #tpu.memory_space<vmem>>, vector<1x128xf32>
    %194 = arith.addf %193, %0 : vector<1x128xf32>
    %c3_161 = arith.constant 3 : index
    %c3_162 = arith.constant 3 : index
    %c0_163 = arith.constant 0 : index
    %195 = vector.load %arg7[%c3_161, %c3_162, %c0_163] : memref<8x8x128xf32, #tpu.memory_space<vmem>>, vector<1x1x128xf32>
    %196 = vector.shape_cast %195 : vector<1x1x128xf32> to vector<1x128xf32>
    %197 = vector.shape_cast %194 : vector<1x128xf32> to vector<1x1x128xf32>
    tpu.vector_store %arg7[%c3_161, %c3_162, %c0_163], %197 {strides = array<i32>} : memref<8x8x128xf32, #tpu.memory_space<vmem>>, vector<1x1x128xf32>,
    %c3_164 = arith.constant 3 : index
    %c4_165 = arith.constant 4 : index
    %198 = memref.load %arg0[%c3_164, %c4_165] : memref<8x8xi32, #tpu.memory_space<smem>>
    %199 = arith.index_cast %198 : i32 to index
    %c0_166 = arith.constant 0 : index
    %200 = vector.load %arg1[%199, %c0_166] : memref<32x128xf32, #tpu.memory_space<vmem>>, vector<1x128xf32>
    %201 = arith.addf %200, %0 : vector<1x128xf32>
    %c3_167 = arith.constant 3 : index
    %c4_168 = arith.constant 4 : index
    %c0_169 = arith.constant 0 : index
    %202 = vector.load %arg7[%c3_167, %c4_168, %c0_169] : memref<8x8x128xf32, #tpu.memory_space<vmem>>, vector<1x1x128xf32>
    %203 = vector.shape_cast %202 : vector<1x1x128xf32> to vector<1x128xf32>
    %204 = vector.shape_cast %201 : vector<1x128xf32> to vector<1x1x128xf32>
    tpu.vector_store %arg7[%c3_167, %c4_168, %c0_169], %204 {strides = array<i32>} : memref<8x8x128xf32, #tpu.memory_space<vmem>>, vector<1x1x128xf32>,
    %c3_170 = arith.constant 3 : index
    %c5_171 = arith.constant 5 : index
    %205 = memref.load %arg0[%c3_170, %c5_171] : memref<8x8xi32, #tpu.memory_space<smem>>
    %206 = arith.index_cast %205 : i32 to index
    %c0_172 = arith.constant 0 : index
    %207 = vector.load %arg1[%206, %c0_172] : memref<32x128xf32, #tpu.memory_space<vmem>>, vector<1x128xf32>
    %208 = arith.addf %207, %0 : vector<1x128xf32>
    %c3_173 = arith.constant 3 : index
    %c5_174 = arith.constant 5 : index
    %c0_175 = arith.constant 0 : index
    %209 = vector.load %arg7[%c3_173, %c5_174, %c0_175] : memref<8x8x128xf32, #tpu.memory_space<vmem>>, vector<1x1x128xf32>
    %210 = vector.shape_cast %209 : vector<1x1x128xf32> to vector<1x128xf32>
    %211 = vector.shape_cast %208 : vector<1x128xf32> to vector<1x1x128xf32>
    tpu.vector_store %arg7[%c3_173, %c5_174, %c0_175], %211 {strides = array<i32>} : memref<8x8x128xf32, #tpu.memory_space<vmem>>, vector<1x1x128xf32>,
    %c3_176 = arith.constant 3 : index
    %c6_177 = arith.constant 6 : index
    %212 = memref.load %arg0[%c3_176, %c6_177] : memref<8x8xi32, #tpu.memory_space<smem>>
    %213 = arith.index_cast %212 : i32 to index
    %c0_178 = arith.constant 0 : index
    %214 = vector.load %arg1[%213, %c0_178] : memref<32x128xf32, #tpu.memory_space<vmem>>, vector<1x128xf32>
    %215 = arith.addf %214, %0 : vector<1x128xf32>
    %c3_179 = arith.constant 3 : index
    %c6_180 = arith.constant 6 : index
    %c0_181 = arith.constant 0 : index
    %216 = vector.load %arg7[%c3_179, %c6_180, %c0_181] : memref<8x8x128xf32, #tpu.memory_space<vmem>>, vector<1x1x128xf32>
    %217 = vector.shape_cast %216 : vector<1x1x128xf32> to vector<1x128xf32>
    %218 = vector.shape_cast %215 : vector<1x128xf32> to vector<1x1x128xf32>
    tpu.vector_store %arg7[%c3_179, %c6_180, %c0_181], %218 {strides = array<i32>} : memref<8x8x128xf32, #tpu.memory_space<vmem>>, vector<1x1x128xf32>,
    %c3_182 = arith.constant 3 : index
    %c7_183 = arith.constant 7 : index
    %219 = memref.load %arg0[%c3_182, %c7_183] : memref<8x8xi32, #tpu.memory_space<smem>>
    %220 = arith.index_cast %219 : i32 to index
    %c0_184 = arith.constant 0 : index
    %221 = vector.load %arg1[%220, %c0_184] : memref<32x128xf32, #tpu.memory_space<vmem>>, vector<1x128xf32>
    %222 = arith.addf %221, %0 : vector<1x128xf32>
    %c3_185 = arith.constant 3 : index
    %c7_186 = arith.constant 7 : index
    %c0_187 = arith.constant 0 : index
    %223 = vector.load %arg7[%c3_185, %c7_186, %c0_187] : memref<8x8x128xf32, #tpu.memory_space<vmem>>, vector<1x1x128xf32>
    %224 = vector.shape_cast %223 : vector<1x1x128xf32> to vector<1x128xf32>
    %225 = vector.shape_cast %222 : vector<1x128xf32> to vector<1x1x128xf32>
    tpu.vector_store %arg7[%c3_185, %c7_186, %c0_187], %225 {strides = array<i32>} : memref<8x8x128xf32, #tpu.memory_space<vmem>>, vector<1x1x128xf32>,
    %c4_188 = arith.constant 4 : index
    %c0_189 = arith.constant 0 : index
    %226 = memref.load %arg0[%c4_188, %c0_189] : memref<8x8xi32, #tpu.memory_space<smem>>
    %227 = arith.index_cast %226 : i32 to index
    %c0_190 = arith.constant 0 : index
    %228 = vector.load %arg1[%227, %c0_190] : memref<32x128xf32, #tpu.memory_space<vmem>>, vector<1x128xf32>
    %229 = arith.addf %228, %0 : vector<1x128xf32>
    %c4_191 = arith.constant 4 : index
    %c0_192 = arith.constant 0 : index
    %c0_193 = arith.constant 0 : index
    %230 = vector.load %arg7[%c4_191, %c0_192, %c0_193] : memref<8x8x128xf32, #tpu.memory_space<vmem>>, vector<1x1x128xf32>
    %231 = vector.shape_cast %230 : vector<1x1x128xf32> to vector<1x128xf32>
    %232 = vector.shape_cast %229 : vector<1x128xf32> to vector<1x1x128xf32>
    tpu.vector_store %arg7[%c4_191, %c0_192, %c0_193], %232 {strides = array<i32>} : memref<8x8x128xf32, #tpu.memory_space<vmem>>, vector<1x1x128xf32>,
    %c4_194 = arith.constant 4 : index
    %c1_195 = arith.constant 1 : index
    %233 = memref.load %arg0[%c4_194, %c1_195] : memref<8x8xi32, #tpu.memory_space<smem>>
    %234 = arith.index_cast %233 : i32 to index
    %c0_196 = arith.constant 0 : index
    %235 = vector.load %arg1[%234, %c0_196] : memref<32x128xf32, #tpu.memory_space<vmem>>, vector<1x128xf32>
    %236 = arith.addf %235, %0 : vector<1x128xf32>
    %c4_197 = arith.constant 4 : index
    %c1_198 = arith.constant 1 : index
    %c0_199 = arith.constant 0 : index
    %237 = vector.load %arg7[%c4_197, %c1_198, %c0_199] : memref<8x8x128xf32, #tpu.memory_space<vmem>>, vector<1x1x128xf32>
    %238 = vector.shape_cast %237 : vector<1x1x128xf32> to vector<1x128xf32>
    %239 = vector.shape_cast %236 : vector<1x128xf32> to vector<1x1x128xf32>
    tpu.vector_store %arg7[%c4_197, %c1_198, %c0_199], %239 {strides = array<i32>} : memref<8x8x128xf32, #tpu.memory_space<vmem>>, vector<1x1x128xf32>,
    %c4_200 = arith.constant 4 : index
    %c2_201 = arith.constant 2 : index
    %240 = memref.load %arg0[%c4_200, %c2_201] : memref<8x8xi32, #tpu.memory_space<smem>>
    %241 = arith.index_cast %240 : i32 to index
    %c0_202 = arith.constant 0 : index
    %242 = vector.load %arg1[%241, %c0_202] : memref<32x128xf32, #tpu.memory_space<vmem>>, vector<1x128xf32>
    %243 = arith.addf %242, %0 : vector<1x128xf32>
    %c4_203 = arith.constant 4 : index
    %c2_204 = arith.constant 2 : index
    %c0_205 = arith.constant 0 : index
    %244 = vector.load %arg7[%c4_203, %c2_204, %c0_205] : memref<8x8x128xf32, #tpu.memory_space<vmem>>, vector<1x1x128xf32>
    %245 = vector.shape_cast %244 : vector<1x1x128xf32> to vector<1x128xf32>
    %246 = vector.shape_cast %243 : vector<1x128xf32> to vector<1x1x128xf32>
    tpu.vector_store %arg7[%c4_203, %c2_204, %c0_205], %246 {strides = array<i32>} : memref<8x8x128xf32, #tpu.memory_space<vmem>>, vector<1x1x128xf32>,
    %c4_206 = arith.constant 4 : index
    %c3_207 = arith.constant 3 : index
    %247 = memref.load %arg0[%c4_206, %c3_207] : memref<8x8xi32, #tpu.memory_space<smem>>
    %248 = arith.index_cast %247 : i32 to index
    %c0_208 = arith.constant 0 : index
    %249 = vector.load %arg1[%248, %c0_208] : memref<32x128xf32, #tpu.memory_space<vmem>>, vector<1x128xf32>
    %250 = arith.addf %249, %0 : vector<1x128xf32>
    %c4_209 = arith.constant 4 : index
    %c3_210 = arith.constant 3 : index
    %c0_211 = arith.constant 0 : index
    %251 = vector.load %arg7[%c4_209, %c3_210, %c0_211] : memref<8x8x128xf32, #tpu.memory_space<vmem>>, vector<1x1x128xf32>
    %252 = vector.shape_cast %251 : vector<1x1x128xf32> to vector<1x128xf32>
    %253 = vector.shape_cast %250 : vector<1x128xf32> to vector<1x1x128xf32>
    tpu.vector_store %arg7[%c4_209, %c3_210, %c0_211], %253 {strides = array<i32>} : memref<8x8x128xf32, #tpu.memory_space<vmem>>, vector<1x1x128xf32>,
    %c4_212 = arith.constant 4 : index
    %c4_213 = arith.constant 4 : index
    %254 = memref.load %arg0[%c4_212, %c4_213] : memref<8x8xi32, #tpu.memory_space<smem>>
    %255 = arith.index_cast %254 : i32 to index
    %c0_214 = arith.constant 0 : index
    %256 = vector.load %arg1[%255, %c0_214] : memref<32x128xf32, #tpu.memory_space<vmem>>, vector<1x128xf32>
    %257 = arith.addf %256, %0 : vector<1x128xf32>
    %c4_215 = arith.constant 4 : index
    %c4_216 = arith.constant 4 : index
    %c0_217 = arith.constant 0 : index
    %258 = vector.load %arg7[%c4_215, %c4_216, %c0_217] : memref<8x8x128xf32, #tpu.memory_space<vmem>>, vector<1x1x128xf32>
    %259 = vector.shape_cast %258 : vector<1x1x128xf32> to vector<1x128xf32>
    %260 = vector.shape_cast %257 : vector<1x128xf32> to vector<1x1x128xf32>
    tpu.vector_store %arg7[%c4_215, %c4_216, %c0_217], %260 {strides = array<i32>} : memref<8x8x128xf32, #tpu.memory_space<vmem>>, vector<1x1x128xf32>,
    %c4_218 = arith.constant 4 : index
    %c5_219 = arith.constant 5 : index
    %261 = memref.load %arg0[%c4_218, %c5_219] : memref<8x8xi32, #tpu.memory_space<smem>>
    %262 = arith.index_cast %261 : i32 to index
    %c0_220 = arith.constant 0 : index
    %263 = vector.load %arg1[%262, %c0_220] : memref<32x128xf32, #tpu.memory_space<vmem>>, vector<1x128xf32>
    %264 = arith.addf %263, %0 : vector<1x128xf32>
    %c4_221 = arith.constant 4 : index
    %c5_222 = arith.constant 5 : index
    %c0_223 = arith.constant 0 : index
    %265 = vector.load %arg7[%c4_221, %c5_222, %c0_223] : memref<8x8x128xf32, #tpu.memory_space<vmem>>, vector<1x1x128xf32>
    %266 = vector.shape_cast %265 : vector<1x1x128xf32> to vector<1x128xf32>
    %267 = vector.shape_cast %264 : vector<1x128xf32> to vector<1x1x128xf32>
    tpu.vector_store %arg7[%c4_221, %c5_222, %c0_223], %267 {strides = array<i32>} : memref<8x8x128xf32, #tpu.memory_space<vmem>>, vector<1x1x128xf32>,
    %c4_224 = arith.constant 4 : index
    %c6_225 = arith.constant 6 : index
    %268 = memref.load %arg0[%c4_224, %c6_225] : memref<8x8xi32, #tpu.memory_space<smem>>
    %269 = arith.index_cast %268 : i32 to index
    %c0_226 = arith.constant 0 : index
    %270 = vector.load %arg1[%269, %c0_226] : memref<32x128xf32, #tpu.memory_space<vmem>>, vector<1x128xf32>
    %271 = arith.addf %270, %0 : vector<1x128xf32>
    %c4_227 = arith.constant 4 : index
    %c6_228 = arith.constant 6 : index
    %c0_229 = arith.constant 0 : index
    %272 = vector.load %arg7[%c4_227, %c6_228, %c0_229] : memref<8x8x128xf32, #tpu.memory_space<vmem>>, vector<1x1x128xf32>
    %273 = vector.shape_cast %272 : vector<1x1x128xf32> to vector<1x128xf32>
    %274 = vector.shape_cast %271 : vector<1x128xf32> to vector<1x1x128xf32>
    tpu.vector_store %arg7[%c4_227, %c6_228, %c0_229], %274 {strides = array<i32>} : memref<8x8x128xf32, #tpu.memory_space<vmem>>, vector<1x1x128xf32>,
    %c4_230 = arith.constant 4 : index
    %c7_231 = arith.constant 7 : index
    %275 = memref.load %arg0[%c4_230, %c7_231] : memref<8x8xi32, #tpu.memory_space<smem>>
    %276 = arith.index_cast %275 : i32 to index
    %c0_232 = arith.constant 0 : index
    %277 = vector.load %arg1[%276, %c0_232] : memref<32x128xf32, #tpu.memory_space<vmem>>, vector<1x128xf32>
    %278 = arith.addf %277, %0 : vector<1x128xf32>
    %c4_233 = arith.constant 4 : index
    %c7_234 = arith.constant 7 : index
    %c0_235 = arith.constant 0 : index
    %279 = vector.load %arg7[%c4_233, %c7_234, %c0_235] : memref<8x8x128xf32, #tpu.memory_space<vmem>>, vector<1x1x128xf32>
    %280 = vector.shape_cast %279 : vector<1x1x128xf32> to vector<1x128xf32>
    %281 = vector.shape_cast %278 : vector<1x128xf32> to vector<1x1x128xf32>
    tpu.vector_store %arg7[%c4_233, %c7_234, %c0_235], %281 {strides = array<i32>} : memref<8x8x128xf32, #tpu.memory_space<vmem>>, vector<1x1x128xf32>,
    %c5_236 = arith.constant 5 : index
    %c0_237 = arith.constant 0 : index
    %282 = memref.load %arg0[%c5_236, %c0_237] : memref<8x8xi32, #tpu.memory_space<smem>>
    %283 = arith.index_cast %282 : i32 to index
    %c0_238 = arith.constant 0 : index
    %284 = vector.load %arg1[%283, %c0_238] : memref<32x128xf32, #tpu.memory_space<vmem>>, vector<1x128xf32>
    %285 = arith.addf %284, %0 : vector<1x128xf32>
    %c5_239 = arith.constant 5 : index
    %c0_240 = arith.constant 0 : index
    %c0_241 = arith.constant 0 : index
    %286 = vector.load %arg7[%c5_239, %c0_240, %c0_241] : memref<8x8x128xf32, #tpu.memory_space<vmem>>, vector<1x1x128xf32>
    %287 = vector.shape_cast %286 : vector<1x1x128xf32> to vector<1x128xf32>
    %288 = vector.shape_cast %285 : vector<1x128xf32> to vector<1x1x128xf32>
    tpu.vector_store %arg7[%c5_239, %c0_240, %c0_241], %288 {strides = array<i32>} : memref<8x8x128xf32, #tpu.memory_space<vmem>>, vector<1x1x128xf32>,
    %c5_242 = arith.constant 5 : index
    %c1_243 = arith.constant 1 : index
    %289 = memref.load %arg0[%c5_242, %c1_243] : memref<8x8xi32, #tpu.memory_space<smem>>
    %290 = arith.index_cast %289 : i32 to index
    %c0_244 = arith.constant 0 : index
    %291 = vector.load %arg1[%290, %c0_244] : memref<32x128xf32, #tpu.memory_space<vmem>>, vector<1x128xf32>
    %292 = arith.addf %291, %0 : vector<1x128xf32>
    %c5_245 = arith.constant 5 : index
    %c1_246 = arith.constant 1 : index
    %c0_247 = arith.constant 0 : index
    %293 = vector.load %arg7[%c5_245, %c1_246, %c0_247] : memref<8x8x128xf32, #tpu.memory_space<vmem>>, vector<1x1x128xf32>
    %294 = vector.shape_cast %293 : vector<1x1x128xf32> to vector<1x128xf32>
    %295 = vector.shape_cast %292 : vector<1x128xf32> to vector<1x1x128xf32>
    tpu.vector_store %arg7[%c5_245, %c1_246, %c0_247], %295 {strides = array<i32>} : memref<8x8x128xf32, #tpu.memory_space<vmem>>, vector<1x1x128xf32>,
    %c5_248 = arith.constant 5 : index
    %c2_249 = arith.constant 2 : index
    %296 = memref.load %arg0[%c5_248, %c2_249] : memref<8x8xi32, #tpu.memory_space<smem>>
    %297 = arith.index_cast %296 : i32 to index
    %c0_250 = arith.constant 0 : index
    %298 = vector.load %arg1[%297, %c0_250] : memref<32x128xf32, #tpu.memory_space<vmem>>, vector<1x128xf32>
    %299 = arith.addf %298, %0 : vector<1x128xf32>
    %c5_251 = arith.constant 5 : index
    %c2_252 = arith.constant 2 : index
    %c0_253 = arith.constant 0 : index
    %300 = vector.load %arg7[%c5_251, %c2_252, %c0_253] : memref<8x8x128xf32, #tpu.memory_space<vmem>>, vector<1x1x128xf32>
    %301 = vector.shape_cast %300 : vector<1x1x128xf32> to vector<1x128xf32>
    %302 = vector.shape_cast %299 : vector<1x128xf32> to vector<1x1x128xf32>
    tpu.vector_store %arg7[%c5_251, %c2_252, %c0_253], %302 {strides = array<i32>} : memref<8x8x128xf32, #tpu.memory_space<vmem>>, vector<1x1x128xf32>,
    %c5_254 = arith.constant 5 : index
    %c3_255 = arith.constant 3 : index
    %303 = memref.load %arg0[%c5_254, %c3_255] : memref<8x8xi32, #tpu.memory_space<smem>>
    %304 = arith.index_cast %303 : i32 to index
    %c0_256 = arith.constant 0 : index
    %305 = vector.load %arg1[%304, %c0_256] : memref<32x128xf32, #tpu.memory_space<vmem>>, vector<1x128xf32>
    %306 = arith.addf %305, %0 : vector<1x128xf32>
    %c5_257 = arith.constant 5 : index
    %c3_258 = arith.constant 3 : index
    %c0_259 = arith.constant 0 : index
    %307 = vector.load %arg7[%c5_257, %c3_258, %c0_259] : memref<8x8x128xf32, #tpu.memory_space<vmem>>, vector<1x1x128xf32>
    %308 = vector.shape_cast %307 : vector<1x1x128xf32> to vector<1x128xf32>
    %309 = vector.shape_cast %306 : vector<1x128xf32> to vector<1x1x128xf32>
    tpu.vector_store %arg7[%c5_257, %c3_258, %c0_259], %309 {strides = array<i32>} : memref<8x8x128xf32, #tpu.memory_space<vmem>>, vector<1x1x128xf32>,
    %c5_260 = arith.constant 5 : index
    %c4_261 = arith.constant 4 : index
    %310 = memref.load %arg0[%c5_260, %c4_261] : memref<8x8xi32, #tpu.memory_space<smem>>
    %311 = arith.index_cast %310 : i32 to index
    %c0_262 = arith.constant 0 : index
    %312 = vector.load %arg1[%311, %c0_262] : memref<32x128xf32, #tpu.memory_space<vmem>>, vector<1x128xf32>
    %313 = arith.addf %312, %0 : vector<1x128xf32>
    %c5_263 = arith.constant 5 : index
    %c4_264 = arith.constant 4 : index
    %c0_265 = arith.constant 0 : index
    %314 = vector.load %arg7[%c5_263, %c4_264, %c0_265] : memref<8x8x128xf32, #tpu.memory_space<vmem>>, vector<1x1x128xf32>
    %315 = vector.shape_cast %314 : vector<1x1x128xf32> to vector<1x128xf32>
    %316 = vector.shape_cast %313 : vector<1x128xf32> to vector<1x1x128xf32>
    tpu.vector_store %arg7[%c5_263, %c4_264, %c0_265], %316 {strides = array<i32>} : memref<8x8x128xf32, #tpu.memory_space<vmem>>, vector<1x1x128xf32>,
    %c5_266 = arith.constant 5 : index
    %c5_267 = arith.constant 5 : index
    %317 = memref.load %arg0[%c5_266, %c5_267] : memref<8x8xi32, #tpu.memory_space<smem>>
    %318 = arith.index_cast %317 : i32 to index
    %c0_268 = arith.constant 0 : index
    %319 = vector.load %arg1[%318, %c0_268] : memref<32x128xf32, #tpu.memory_space<vmem>>, vector<1x128xf32>
    %320 = arith.addf %319, %0 : vector<1x128xf32>
    %c5_269 = arith.constant 5 : index
    %c5_270 = arith.constant 5 : index
    %c0_271 = arith.constant 0 : index
    %321 = vector.load %arg7[%c5_269, %c5_270, %c0_271] : memref<8x8x128xf32, #tpu.memory_space<vmem>>, vector<1x1x128xf32>
    %322 = vector.shape_cast %321 : vector<1x1x128xf32> to vector<1x128xf32>
    %323 = vector.shape_cast %320 : vector<1x128xf32> to vector<1x1x128xf32>
    tpu.vector_store %arg7[%c5_269, %c5_270, %c0_271], %323 {strides = array<i32>} : memref<8x8x128xf32, #tpu.memory_space<vmem>>, vector<1x1x128xf32>,
    %c5_272 = arith.constant 5 : index
    %c6_273 = arith.constant 6 : index
    %324 = memref.load %arg0[%c5_272, %c6_273] : memref<8x8xi32, #tpu.memory_space<smem>>
    %325 = arith.index_cast %324 : i32 to index
    %c0_274 = arith.constant 0 : index
    %326 = vector.load %arg1[%325, %c0_274] : memref<32x128xf32, #tpu.memory_space<vmem>>, vector<1x128xf32>
    %327 = arith.addf %326, %0 : vector<1x128xf32>
    %c5_275 = arith.constant 5 : index
    %c6_276 = arith.constant 6 : index
    %c0_277 = arith.constant 0 : index
    %328 = vector.load %arg7[%c5_275, %c6_276, %c0_277] : memref<8x8x128xf32, #tpu.memory_space<vmem>>, vector<1x1x128xf32>
    %329 = vector.shape_cast %328 : vector<1x1x128xf32> to vector<1x128xf32>
    %330 = vector.shape_cast %327 : vector<1x128xf32> to vector<1x1x128xf32>
    tpu.vector_store %arg7[%c5_275, %c6_276, %c0_277], %330 {strides = array<i32>} : memref<8x8x128xf32, #tpu.memory_space<vmem>>, vector<1x1x128xf32>,
    %c5_278 = arith.constant 5 : index
    %c7_279 = arith.constant 7 : index
    %331 = memref.load %arg0[%c5_278, %c7_279] : memref<8x8xi32, #tpu.memory_space<smem>>
    %332 = arith.index_cast %331 : i32 to index
    %c0_280 = arith.constant 0 : index
    %333 = vector.load %arg1[%332, %c0_280] : memref<32x128xf32, #tpu.memory_space<vmem>>, vector<1x128xf32>
    %334 = arith.addf %333, %0 : vector<1x128xf32>
    %c5_281 = arith.constant 5 : index
    %c7_282 = arith.constant 7 : index
    %c0_283 = arith.constant 0 : index
    %335 = vector.load %arg7[%c5_281, %c7_282, %c0_283] : memref<8x8x128xf32, #tpu.memory_space<vmem>>, vector<1x1x128xf32>
    %336 = vector.shape_cast %335 : vector<1x1x128xf32> to vector<1x128xf32>
    %337 = vector.shape_cast %334 : vector<1x128xf32> to vector<1x1x128xf32>
    tpu.vector_store %arg7[%c5_281, %c7_282, %c0_283], %337 {strides = array<i32>} : memref<8x8x128xf32, #tpu.memory_space<vmem>>, vector<1x1x128xf32>,
    %c6_284 = arith.constant 6 : index
    %c0_285 = arith.constant 0 : index
    %338 = memref.load %arg0[%c6_284, %c0_285] : memref<8x8xi32, #tpu.memory_space<smem>>
    %339 = arith.index_cast %338 : i32 to index
    %c0_286 = arith.constant 0 : index
    %340 = vector.load %arg1[%339, %c0_286] : memref<32x128xf32, #tpu.memory_space<vmem>>, vector<1x128xf32>
    %341 = arith.addf %340, %0 : vector<1x128xf32>
    %c6_287 = arith.constant 6 : index
    %c0_288 = arith.constant 0 : index
    %c0_289 = arith.constant 0 : index
    %342 = vector.load %arg7[%c6_287, %c0_288, %c0_289] : memref<8x8x128xf32, #tpu.memory_space<vmem>>, vector<1x1x128xf32>
    %343 = vector.shape_cast %342 : vector<1x1x128xf32> to vector<1x128xf32>
    %344 = vector.shape_cast %341 : vector<1x128xf32> to vector<1x1x128xf32>
    tpu.vector_store %arg7[%c6_287, %c0_288, %c0_289], %344 {strides = array<i32>} : memref<8x8x128xf32, #tpu.memory_space<vmem>>, vector<1x1x128xf32>,
    %c6_290 = arith.constant 6 : index
    %c1_291 = arith.constant 1 : index
    %345 = memref.load %arg0[%c6_290, %c1_291] : memref<8x8xi32, #tpu.memory_space<smem>>
    %346 = arith.index_cast %345 : i32 to index
    %c0_292 = arith.constant 0 : index
    %347 = vector.load %arg1[%346, %c0_292] : memref<32x128xf32, #tpu.memory_space<vmem>>, vector<1x128xf32>
    %348 = arith.addf %347, %0 : vector<1x128xf32>
    %c6_293 = arith.constant 6 : index
    %c1_294 = arith.constant 1 : index
    %c0_295 = arith.constant 0 : index
    %349 = vector.load %arg7[%c6_293, %c1_294, %c0_295] : memref<8x8x128xf32, #tpu.memory_space<vmem>>, vector<1x1x128xf32>
    %350 = vector.shape_cast %349 : vector<1x1x128xf32> to vector<1x128xf32>
    %351 = vector.shape_cast %348 : vector<1x128xf32> to vector<1x1x128xf32>
    tpu.vector_store %arg7[%c6_293, %c1_294, %c0_295], %351 {strides = array<i32>} : memref<8x8x128xf32, #tpu.memory_space<vmem>>, vector<1x1x128xf32>,
    %c6_296 = arith.constant 6 : index
    %c2_297 = arith.constant 2 : index
    %352 = memref.load %arg0[%c6_296, %c2_297] : memref<8x8xi32, #tpu.memory_space<smem>>
    %353 = arith.index_cast %352 : i32 to index
    %c0_298 = arith.constant 0 : index
    %354 = vector.load %arg1[%353, %c0_298] : memref<32x128xf32, #tpu.memory_space<vmem>>, vector<1x128xf32>
    %355 = arith.addf %354, %0 : vector<1x128xf32>
    %c6_299 = arith.constant 6 : index
    %c2_300 = arith.constant 2 : index
    %c0_301 = arith.constant 0 : index
    %356 = vector.load %arg7[%c6_299, %c2_300, %c0_301] : memref<8x8x128xf32, #tpu.memory_space<vmem>>, vector<1x1x128xf32>
    %357 = vector.shape_cast %356 : vector<1x1x128xf32> to vector<1x128xf32>
    %358 = vector.shape_cast %355 : vector<1x128xf32> to vector<1x1x128xf32>
    tpu.vector_store %arg7[%c6_299, %c2_300, %c0_301], %358 {strides = array<i32>} : memref<8x8x128xf32, #tpu.memory_space<vmem>>, vector<1x1x128xf32>,
    %c6_302 = arith.constant 6 : index
    %c3_303 = arith.constant 3 : index
    %359 = memref.load %arg0[%c6_302, %c3_303] : memref<8x8xi32, #tpu.memory_space<smem>>
    %360 = arith.index_cast %359 : i32 to index
    %c0_304 = arith.constant 0 : index
    %361 = vector.load %arg1[%360, %c0_304] : memref<32x128xf32, #tpu.memory_space<vmem>>, vector<1x128xf32>
    %362 = arith.addf %361, %0 : vector<1x128xf32>
    %c6_305 = arith.constant 6 : index
    %c3_306 = arith.constant 3 : index
    %c0_307 = arith.constant 0 : index
    %363 = vector.load %arg7[%c6_305, %c3_306, %c0_307] : memref<8x8x128xf32, #tpu.memory_space<vmem>>, vector<1x1x128xf32>
    %364 = vector.shape_cast %363 : vector<1x1x128xf32> to vector<1x128xf32>
    %365 = vector.shape_cast %362 : vector<1x128xf32> to vector<1x1x128xf32>
    tpu.vector_store %arg7[%c6_305, %c3_306, %c0_307], %365 {strides = array<i32>} : memref<8x8x128xf32, #tpu.memory_space<vmem>>, vector<1x1x128xf32>,
    %c6_308 = arith.constant 6 : index
    %c4_309 = arith.constant 4 : index
    %366 = memref.load %arg0[%c6_308, %c4_309] : memref<8x8xi32, #tpu.memory_space<smem>>
    %367 = arith.index_cast %366 : i32 to index
    %c0_310 = arith.constant 0 : index
    %368 = vector.load %arg1[%367, %c0_310] : memref<32x128xf32, #tpu.memory_space<vmem>>, vector<1x128xf32>
    %369 = arith.addf %368, %0 : vector<1x128xf32>
    %c6_311 = arith.constant 6 : index
    %c4_312 = arith.constant 4 : index
    %c0_313 = arith.constant 0 : index
    %370 = vector.load %arg7[%c6_311, %c4_312, %c0_313] : memref<8x8x128xf32, #tpu.memory_space<vmem>>, vector<1x1x128xf32>
    %371 = vector.shape_cast %370 : vector<1x1x128xf32> to vector<1x128xf32>
    %372 = vector.shape_cast %369 : vector<1x128xf32> to vector<1x1x128xf32>
    tpu.vector_store %arg7[%c6_311, %c4_312, %c0_313], %372 {strides = array<i32>} : memref<8x8x128xf32, #tpu.memory_space<vmem>>, vector<1x1x128xf32>,
    %c6_314 = arith.constant 6 : index
    %c5_315 = arith.constant 5 : index
    %373 = memref.load %arg0[%c6_314, %c5_315] : memref<8x8xi32, #tpu.memory_space<smem>>
    %374 = arith.index_cast %373 : i32 to index
    %c0_316 = arith.constant 0 : index
    %375 = vector.load %arg1[%374, %c0_316] : memref<32x128xf32, #tpu.memory_space<vmem>>, vector<1x128xf32>
    %376 = arith.addf %375, %0 : vector<1x128xf32>
    %c6_317 = arith.constant 6 : index
    %c5_318 = arith.constant 5 : index
    %c0_319 = arith.constant 0 : index
    %377 = vector.load %arg7[%c6_317, %c5_318, %c0_319] : memref<8x8x128xf32, #tpu.memory_space<vmem>>, vector<1x1x128xf32>
    %378 = vector.shape_cast %377 : vector<1x1x128xf32> to vector<1x128xf32>
    %379 = vector.shape_cast %376 : vector<1x128xf32> to vector<1x1x128xf32>
    tpu.vector_store %arg7[%c6_317, %c5_318, %c0_319], %379 {strides = array<i32>} : memref<8x8x128xf32, #tpu.memory_space<vmem>>, vector<1x1x128xf32>,
    %c6_320 = arith.constant 6 : index
    %c6_321 = arith.constant 6 : index
    %380 = memref.load %arg0[%c6_320, %c6_321] : memref<8x8xi32, #tpu.memory_space<smem>>
    %381 = arith.index_cast %380 : i32 to index
    %c0_322 = arith.constant 0 : index
    %382 = vector.load %arg1[%381, %c0_322] : memref<32x128xf32, #tpu.memory_space<vmem>>, vector<1x128xf32>
    %383 = arith.addf %382, %0 : vector<1x128xf32>
    %c6_323 = arith.constant 6 : index
    %c6_324 = arith.constant 6 : index
    %c0_325 = arith.constant 0 : index
    %384 = vector.load %arg7[%c6_323, %c6_324, %c0_325] : memref<8x8x128xf32, #tpu.memory_space<vmem>>, vector<1x1x128xf32>
    %385 = vector.shape_cast %384 : vector<1x1x128xf32> to vector<1x128xf32>
    %386 = vector.shape_cast %383 : vector<1x128xf32> to vector<1x1x128xf32>
    tpu.vector_store %arg7[%c6_323, %c6_324, %c0_325], %386 {strides = array<i32>} : memref<8x8x128xf32, #tpu.memory_space<vmem>>, vector<1x1x128xf32>,
    %c6_326 = arith.constant 6 : index
    %c7_327 = arith.constant 7 : index
    %387 = memref.load %arg0[%c6_326, %c7_327] : memref<8x8xi32, #tpu.memory_space<smem>>
    %388 = arith.index_cast %387 : i32 to index
    %c0_328 = arith.constant 0 : index
    %389 = vector.load %arg1[%388, %c0_328] : memref<32x128xf32, #tpu.memory_space<vmem>>, vector<1x128xf32>
    %390 = arith.addf %389, %0 : vector<1x128xf32>
    %c6_329 = arith.constant 6 : index
    %c7_330 = arith.constant 7 : index
    %c0_331 = arith.constant 0 : index
    %391 = vector.load %arg7[%c6_329, %c7_330, %c0_331] : memref<8x8x128xf32, #tpu.memory_space<vmem>>, vector<1x1x128xf32>
    %392 = vector.shape_cast %391 : vector<1x1x128xf32> to vector<1x128xf32>
    %393 = vector.shape_cast %390 : vector<1x128xf32> to vector<1x1x128xf32>
    tpu.vector_store %arg7[%c6_329, %c7_330, %c0_331], %393 {strides = array<i32>} : memref<8x8x128xf32, #tpu.memory_space<vmem>>, vector<1x1x128xf32>,
    %c7_332 = arith.constant 7 : index
    %c0_333 = arith.constant 0 : index
    %394 = memref.load %arg0[%c7_332, %c0_333] : memref<8x8xi32, #tpu.memory_space<smem>>
    %395 = arith.index_cast %394 : i32 to index
    %c0_334 = arith.constant 0 : index
    %396 = vector.load %arg1[%395, %c0_334] : memref<32x128xf32, #tpu.memory_space<vmem>>, vector<1x128xf32>
    %397 = arith.addf %396, %0 : vector<1x128xf32>
    %c7_335 = arith.constant 7 : index
    %c0_336 = arith.constant 0 : index
    %c0_337 = arith.constant 0 : index
    %398 = vector.load %arg7[%c7_335, %c0_336, %c0_337] : memref<8x8x128xf32, #tpu.memory_space<vmem>>, vector<1x1x128xf32>
    %399 = vector.shape_cast %398 : vector<1x1x128xf32> to vector<1x128xf32>
    %400 = vector.shape_cast %397 : vector<1x128xf32> to vector<1x1x128xf32>
    tpu.vector_store %arg7[%c7_335, %c0_336, %c0_337], %400 {strides = array<i32>} : memref<8x8x128xf32, #tpu.memory_space<vmem>>, vector<1x1x128xf32>,
    %c7_338 = arith.constant 7 : index
    %c1_339 = arith.constant 1 : index
    %401 = memref.load %arg0[%c7_338, %c1_339] : memref<8x8xi32, #tpu.memory_space<smem>>
    %402 = arith.index_cast %401 : i32 to index
    %c0_340 = arith.constant 0 : index
    %403 = vector.load %arg1[%402, %c0_340] : memref<32x128xf32, #tpu.memory_space<vmem>>, vector<1x128xf32>
    %404 = arith.addf %403, %0 : vector<1x128xf32>
    %c7_341 = arith.constant 7 : index
    %c1_342 = arith.constant 1 : index
    %c0_343 = arith.constant 0 : index
    %405 = vector.load %arg7[%c7_341, %c1_342, %c0_343] : memref<8x8x128xf32, #tpu.memory_space<vmem>>, vector<1x1x128xf32>
    %406 = vector.shape_cast %405 : vector<1x1x128xf32> to vector<1x128xf32>
    %407 = vector.shape_cast %404 : vector<1x128xf32> to vector<1x1x128xf32>
    tpu.vector_store %arg7[%c7_341, %c1_342, %c0_343], %407 {strides = array<i32>} : memref<8x8x128xf32, #tpu.memory_space<vmem>>, vector<1x1x128xf32>,
    %c7_344 = arith.constant 7 : index
    %c2_345 = arith.constant 2 : index
    %408 = memref.load %arg0[%c7_344, %c2_345] : memref<8x8xi32, #tpu.memory_space<smem>>
    %409 = arith.index_cast %408 : i32 to index
    %c0_346 = arith.constant 0 : index
    %410 = vector.load %arg1[%409, %c0_346] : memref<32x128xf32, #tpu.memory_space<vmem>>, vector<1x128xf32>
    %411 = arith.addf %410, %0 : vector<1x128xf32>
    %c7_347 = arith.constant 7 : index
    %c2_348 = arith.constant 2 : index
    %c0_349 = arith.constant 0 : index
    %412 = vector.load %arg7[%c7_347, %c2_348, %c0_349] : memref<8x8x128xf32, #tpu.memory_space<vmem>>, vector<1x1x128xf32>
    %413 = vector.shape_cast %412 : vector<1x1x128xf32> to vector<1x128xf32>
    %414 = vector.shape_cast %411 : vector<1x128xf32> to vector<1x1x128xf32>
    tpu.vector_store %arg7[%c7_347, %c2_348, %c0_349], %414 {strides = array<i32>} : memref<8x8x128xf32, #tpu.memory_space<vmem>>, vector<1x1x128xf32>,
    %c7_350 = arith.constant 7 : index
    %c3_351 = arith.constant 3 : index
    %415 = memref.load %arg0[%c7_350, %c3_351] : memref<8x8xi32, #tpu.memory_space<smem>>
    %416 = arith.index_cast %415 : i32 to index
    %c0_352 = arith.constant 0 : index
    %417 = vector.load %arg1[%416, %c0_352] : memref<32x128xf32, #tpu.memory_space<vmem>>, vector<1x128xf32>
    %418 = arith.addf %417, %0 : vector<1x128xf32>
    %c7_353 = arith.constant 7 : index
    %c3_354 = arith.constant 3 : index
    %c0_355 = arith.constant 0 : index
    %419 = vector.load %arg7[%c7_353, %c3_354, %c0_355] : memref<8x8x128xf32, #tpu.memory_space<vmem>>, vector<1x1x128xf32>
    %420 = vector.shape_cast %419 : vector<1x1x128xf32> to vector<1x128xf32>
    %421 = vector.shape_cast %418 : vector<1x128xf32> to vector<1x1x128xf32>
    tpu.vector_store %arg7[%c7_353, %c3_354, %c0_355], %421 {strides = array<i32>} : memref<8x8x128xf32, #tpu.memory_space<vmem>>, vector<1x1x128xf32>,
    %c7_356 = arith.constant 7 : index
    %c4_357 = arith.constant 4 : index
    %422 = memref.load %arg0[%c7_356, %c4_357] : memref<8x8xi32, #tpu.memory_space<smem>>
    %423 = arith.index_cast %422 : i32 to index
    %c0_358 = arith.constant 0 : index
    %424 = vector.load %arg1[%423, %c0_358] : memref<32x128xf32, #tpu.memory_space<vmem>>, vector<1x128xf32>
    %425 = arith.addf %424, %0 : vector<1x128xf32>
    %c7_359 = arith.constant 7 : index
    %c4_360 = arith.constant 4 : index
    %c0_361 = arith.constant 0 : index
    %426 = vector.load %arg7[%c7_359, %c4_360, %c0_361] : memref<8x8x128xf32, #tpu.memory_space<vmem>>, vector<1x1x128xf32>
    %427 = vector.shape_cast %426 : vector<1x1x128xf32> to vector<1x128xf32>
    %428 = vector.shape_cast %425 : vector<1x128xf32> to vector<1x1x128xf32>
    tpu.vector_store %arg7[%c7_359, %c4_360, %c0_361], %428 {strides = array<i32>} : memref<8x8x128xf32, #tpu.memory_space<vmem>>, vector<1x1x128xf32>,
    %c7_362 = arith.constant 7 : index
    %c5_363 = arith.constant 5 : index
    %429 = memref.load %arg0[%c7_362, %c5_363] : memref<8x8xi32, #tpu.memory_space<smem>>
    %430 = arith.index_cast %429 : i32 to index
    %c0_364 = arith.constant 0 : index
    %431 = vector.load %arg1[%430, %c0_364] : memref<32x128xf32, #tpu.memory_space<vmem>>, vector<1x128xf32>
    %432 = arith.addf %431, %0 : vector<1x128xf32>
    %c7_365 = arith.constant 7 : index
    %c5_366 = arith.constant 5 : index
    %c0_367 = arith.constant 0 : index
    %433 = vector.load %arg7[%c7_365, %c5_366, %c0_367] : memref<8x8x128xf32, #tpu.memory_space<vmem>>, vector<1x1x128xf32>
    %434 = vector.shape_cast %433 : vector<1x1x128xf32> to vector<1x128xf32>
    %435 = vector.shape_cast %432 : vector<1x128xf32> to vector<1x1x128xf32>
    tpu.vector_store %arg7[%c7_365, %c5_366, %c0_367], %435 {strides = array<i32>} : memref<8x8x128xf32, #tpu.memory_space<vmem>>, vector<1x1x128xf32>,
    %c7_368 = arith.constant 7 : index
    %c6_369 = arith.constant 6 : index
    %436 = memref.load %arg0[%c7_368, %c6_369] : memref<8x8xi32, #tpu.memory_space<smem>>
    %437 = arith.index_cast %436 : i32 to index
    %c0_370 = arith.constant 0 : index
    %438 = vector.load %arg1[%437, %c0_370] : memref<32x128xf32, #tpu.memory_space<vmem>>, vector<1x128xf32>
    %439 = arith.addf %438, %0 : vector<1x128xf32>
    %c7_371 = arith.constant 7 : index
    %c6_372 = arith.constant 6 : index
    %c0_373 = arith.constant 0 : index
    %440 = vector.load %arg7[%c7_371, %c6_372, %c0_373] : memref<8x8x128xf32, #tpu.memory_space<vmem>>, vector<1x1x128xf32>
    %441 = vector.shape_cast %440 : vector<1x1x128xf32> to vector<1x128xf32>
    %442 = vector.shape_cast %439 : vector<1x128xf32> to vector<1x1x128xf32>
    tpu.vector_store %arg7[%c7_371, %c6_372, %c0_373], %442 {strides = array<i32>} : memref<8x8x128xf32, #tpu.memory_space<vmem>>, vector<1x1x128xf32>,
    %c7_374 = arith.constant 7 : index
    %c7_375 = arith.constant 7 : index
    %443 = memref.load %arg0[%c7_374, %c7_375] : memref<8x8xi32, #tpu.memory_space<smem>>
    %444 = arith.index_cast %443 : i32 to index
    %c0_376 = arith.constant 0 : index
    %445 = vector.load %arg1[%444, %c0_376] : memref<32x128xf32, #tpu.memory_space<vmem>>, vector<1x128xf32>
    %446 = arith.addf %445, %0 : vector<1x128xf32>
    %c7_377 = arith.constant 7 : index
    %c7_378 = arith.constant 7 : index
    %c0_379 = arith.constant 0 : index
    %447 = vector.load %arg7[%c7_377, %c7_378, %c0_379] : memref<8x8x128xf32, #tpu.memory_space<vmem>>, vector<1x1x128xf32>
    %448 = vector.shape_cast %447 : vector<1x1x128xf32> to vector<1x128xf32>
    %449 = vector.shape_cast %446 : vector<1x128xf32> to vector<1x1x128xf32>
    tpu.vector_store %arg7[%c7_377, %c7_378, %c0_379], %449 {strides = array<i32>} : memref<8x8x128xf32, #tpu.memory_space<vmem>>, vector<1x1x128xf32>,
    %c0_380 = arith.constant 0 : index
    %c0_381 = arith.constant 0 : index
    %c0_382 = arith.constant 0 : index
    %450 = vector.load %arg7[%c0_380, %c0_381, %c0_382] : memref<8x8x128xf32, #tpu.memory_space<vmem>>, vector<1x8x128xf32>
    %451 = vector.shape_cast %450 : vector<1x8x128xf32> to vector<8x128xf32>
    %452 = math.tanh %451 : vector<8x128xf32>
    %c1_383 = arith.constant 1 : index
    %c0_384 = arith.constant 0 : index
    %c0_385 = arith.constant 0 : index
    %453 = vector.load %arg7[%c1_383, %c0_384, %c0_385] : memref<8x8x128xf32, #tpu.memory_space<vmem>>, vector<1x8x128xf32>
    %454 = vector.shape_cast %453 : vector<1x8x128xf32> to vector<8x128xf32>
    %cst = arith.constant dense<0.000000e+00> : vector<8x128xf32>
    %455 = tpu.matmul %452, %1, %cst {dimension_numbers = #tpu.dot_dimension_numbers<[1], [0], [0], [1], [0, 0, 1, 1], [], []>} : vector<8x128xf32>, vector<128x128xf32>, vector<8x128xf32> -> vector<8x128xf32>
    %456 = arith.addf %454, %455 : vector<8x128xf32>
    %457 = math.tanh %456 : vector<8x128xf32>
    %c2_386 = arith.constant 2 : index
    %c0_387 = arith.constant 0 : index
    %c0_388 = arith.constant 0 : index
    %458 = vector.load %arg7[%c2_386, %c0_387, %c0_388] : memref<8x8x128xf32, #tpu.memory_space<vmem>>, vector<1x8x128xf32>
    %459 = vector.shape_cast %458 : vector<1x8x128xf32> to vector<8x128xf32>
    %cst_389 = arith.constant dense<0.000000e+00> : vector<8x128xf32>
    %460 = tpu.matmul %457, %1, %cst_389 {dimension_numbers = #tpu.dot_dimension_numbers<[1], [0], [0], [1], [0, 0, 1, 1], [], []>} : vector<8x128xf32>, vector<128x128xf32>, vector<8x128xf32> -> vector<8x128xf32>
    %461 = arith.addf %459, %460 : vector<8x128xf32>
    %462 = math.tanh %461 : vector<8x128xf32>
    %c3_390 = arith.constant 3 : index
    %c0_391 = arith.constant 0 : index
    %c0_392 = arith.constant 0 : index
    %463 = vector.load %arg7[%c3_390, %c0_391, %c0_392] : memref<8x8x128xf32, #tpu.memory_space<vmem>>, vector<1x8x128xf32>
    %464 = vector.shape_cast %463 : vector<1x8x128xf32> to vector<8x128xf32>
    %cst_393 = arith.constant dense<0.000000e+00> : vector<8x128xf32>
    %465 = tpu.matmul %462, %1, %cst_393 {dimension_numbers = #tpu.dot_dimension_numbers<[1], [0], [0], [1], [0, 0, 1, 1], [], []>} : vector<8x128xf32>, vector<128x128xf32>, vector<8x128xf32> -> vector<8x128xf32>
    %466 = arith.addf %464, %465 : vector<8x128xf32>
    %467 = math.tanh %466 : vector<8x128xf32>
    %c4_394 = arith.constant 4 : index
    %c0_395 = arith.constant 0 : index
    %c0_396 = arith.constant 0 : index
    %468 = vector.load %arg7[%c4_394, %c0_395, %c0_396] : memref<8x8x128xf32, #tpu.memory_space<vmem>>, vector<1x8x128xf32>
    %469 = vector.shape_cast %468 : vector<1x8x128xf32> to vector<8x128xf32>
    %cst_397 = arith.constant dense<0.000000e+00> : vector<8x128xf32>
    %470 = tpu.matmul %467, %1, %cst_397 {dimension_numbers = #tpu.dot_dimension_numbers<[1], [0], [0], [1], [0, 0, 1, 1], [], []>} : vector<8x128xf32>, vector<128x128xf32>, vector<8x128xf32> -> vector<8x128xf32>
    %471 = arith.addf %469, %470 : vector<8x128xf32>
    %472 = math.tanh %471 : vector<8x128xf32>
    %c5_398 = arith.constant 5 : index
    %c0_399 = arith.constant 0 : index
    %c0_400 = arith.constant 0 : index
    %473 = vector.load %arg7[%c5_398, %c0_399, %c0_400] : memref<8x8x128xf32, #tpu.memory_space<vmem>>, vector<1x8x128xf32>
    %474 = vector.shape_cast %473 : vector<1x8x128xf32> to vector<8x128xf32>
    %cst_401 = arith.constant dense<0.000000e+00> : vector<8x128xf32>
    %475 = tpu.matmul %472, %1, %cst_401 {dimension_numbers = #tpu.dot_dimension_numbers<[1], [0], [0], [1], [0, 0, 1, 1], [], []>} : vector<8x128xf32>, vector<128x128xf32>, vector<8x128xf32> -> vector<8x128xf32>
    %476 = arith.addf %474, %475 : vector<8x128xf32>
    %477 = math.tanh %476 : vector<8x128xf32>
    %c6_402 = arith.constant 6 : index
    %c0_403 = arith.constant 0 : index
    %c0_404 = arith.constant 0 : index
    %478 = vector.load %arg7[%c6_402, %c0_403, %c0_404] : memref<8x8x128xf32, #tpu.memory_space<vmem>>, vector<1x8x128xf32>
    %479 = vector.shape_cast %478 : vector<1x8x128xf32> to vector<8x128xf32>
    %cst_405 = arith.constant dense<0.000000e+00> : vector<8x128xf32>
    %480 = tpu.matmul %477, %1, %cst_405 {dimension_numbers = #tpu.dot_dimension_numbers<[1], [0], [0], [1], [0, 0, 1, 1], [], []>} : vector<8x128xf32>, vector<128x128xf32>, vector<8x128xf32> -> vector<8x128xf32>
    %481 = arith.addf %479, %480 : vector<8x128xf32>
    %482 = math.tanh %481 : vector<8x128xf32>
    %c7_406 = arith.constant 7 : index
    %c0_407 = arith.constant 0 : index
    %c0_408 = arith.constant 0 : index
    %483 = vector.load %arg7[%c7_406, %c0_407, %c0_408] : memref<8x8x128xf32, #tpu.memory_space<vmem>>, vector<1x8x128xf32>
    %484 = vector.shape_cast %483 : vector<1x8x128xf32> to vector<8x128xf32>
    %cst_409 = arith.constant dense<0.000000e+00> : vector<8x128xf32>
    %485 = tpu.matmul %482, %1, %cst_409 {dimension_numbers = #tpu.dot_dimension_numbers<[1], [0], [0], [1], [0, 0, 1, 1], [], []>} : vector<8x128xf32>, vector<128x128xf32>, vector<8x128xf32> -> vector<8x128xf32>
    %486 = arith.addf %484, %485 : vector<8x128xf32>
    %487 = math.tanh %486 : vector<8x128xf32>
    %c0_410 = arith.constant 0 : index
    %c0_411 = arith.constant 0 : index
    %488 = vector.load %arg4[%c0_410, %c0_411] : memref<128x128xf32, #tpu.memory_space<vmem>>, vector<128x128xf32>
    %cst_412 = arith.constant dense<0.000000e+00> : vector<8x128xf32>
    %489 = tpu.matmul %487, %488, %cst_412 {dimension_numbers = #tpu.dot_dimension_numbers<[1], [0], [0], [1], [0, 0, 1, 1], [], []>} : vector<8x128xf32>, vector<128x128xf32>, vector<8x128xf32> -> vector<8x128xf32>
    %c0_413 = arith.constant 0 : index
    %c0_414 = arith.constant 0 : index
    %490 = vector.load %arg5[%c0_413, %c0_414] : memref<1x128xf32, #tpu.memory_space<vmem>>, vector<1x128xf32>
    %491 = vector.broadcast %490 : vector<1x128xf32> to vector<8x128xf32>
    %492 = arith.addf %489, %491 : vector<8x128xf32>
    %c0_415 = arith.constant 0 : index
    %c0_416 = arith.constant 0 : index
    %493 = vector.load %arg6[%c0_415, %c0_416] : memref<8x128xf32, #tpu.memory_space<vmem>>, vector<8x128xf32>
    tpu.vector_store %arg6[%c0_415, %c0_416], %492 {strides = array<i32>} : memref<8x128xf32, #tpu.memory_space<vmem>>, vector<8x128xf32>,
    return
  }
}

</mosaic_0001>

<bundles_post_ra>
// kernel: tpu_custom_call.1
= control target key start
LH: loop header
LB: loop body
LE: loop exit
PB: predicated region body
PF: predicated region fallthrough
CT: control target
= control target key end

     0   :  { %11 = vsyncpa [#allocation6], 0  ;;  %s1236_s0 = inlined_call_operand.hbm [shape: s32[8,8], index: 0, kind: input, shape index: {}]   ;;  %s1237_s1 = inlined_call_operand.hbm [shape: f32[32,128], index: 1, kind: input, shape index: {}]   ;;  %s1238_s2 = inlined_call_operand.hbm [shape: f32[128,128], index: 2, kind: input, shape index: {}]   ;;  %s1239_s3 = inlined_call_operand.vmem [shape: f32[1,128], index: 3, kind: input, shape index: {}]   ;;  %s1240_s4 = inlined_call_operand.hbm [shape: f32[128,128], index: 4, kind: input, shape index: {}]   ;;  %s1241_s5 = inlined_call_operand.vmem [shape: f32[1,128], index: 5, kind: input, shape index: {}]   ;;  %s1242_s6 = inlined_call_operand.hbm [shape: f32[8,128], index: 6, kind: output, shape index: {}]  }
   0x1   :  { %12 = vsyncpa [#allocation4], 0 }
   0x2   :  { %13 = vsyncpa [#allocation9], 0 }
   0x3   :  { %14 = vsyncpa [#allocation5], 0  ;;  %s41_s23 = sshll.u32 %s1238_s2, 4  ;;  %s918_s24 = smov [#allocation8]   ;;  %s42_s23 = int_to_ptr.hbm [resolvable:$true] %s41_s23 }
   0x4   :  { %s43_s25 = sshll.u32 %s918_s24, 4  ;;  %s20_s28 = sshll.u32 %s1236_s0, 4  ;;  %s44_s25 = int_to_ptr.vmem [resolvable:$true] %s43_s25  ;;  %s21_s28 = int_to_ptr.hbm [resolvable:$true] %s20_s28 }
   0x5   :  { %s919_s29 = smov 128   ;;  %s920_s30 = smov 8  }
   0x6   :  { %49 = dma.hbm_to_vmem [thread:$0]  %s42_s23, 2048, %s44_s25, [#allocation9], %s919_s29, %s919_s29, %s920_s30  }
   0x7   :  { %s921_s7 = smov [#allocation3]   ;;  %s28_s10 = sshll.u32 %s1237_s1, 4  ;;  %s29_s10 = int_to_ptr.hbm [resolvable:$true] %s28_s10 }
   0x8   :  { %23 = dma.hbm_to_smem %s21_s28, 128, %s921_s7, [#allocation6]  }
   0x9   :  { %s922_s2 = smov [#allocation7]   ;;  %s56_s14 = sshll.u32 %s1240_s4, 4  ;;  %s57_s14 = int_to_ptr.hbm [resolvable:$true] %s56_s14 }
   0xa   :  { %s30_s11 = sshll.u32 %s922_s2, 4  ;;  %s923_s0 = smov [#allocation10]   ;;  %s31_s11 = int_to_ptr.vmem [resolvable:$true] %s30_s11 }
   0xb   :  { %36 = dma.hbm_to_vmem [thread:$0]  %s29_s10, 512, %s31_s11, [#allocation4], %s919_s29, %s919_s29, %s920_s30  }
   0xc   :  { %s58_s15 = sshll.u32 %s923_s0, 4  ;;  %s59_s15 = int_to_ptr.vmem [resolvable:$true] %s58_s15 }
   0xd   :  { %64 = dma.hbm_to_vmem [thread:$0]  %s57_s14, 2048, %s59_s15, [#allocation9], %s919_s29, %s919_s29, %s920_s30  }
   0xe   :  { %910 = dma.done.wait [#allocation6], 128  }
   0xf   :  { %911 = vsyncadd [#allocation6], 4294967168 }
  0x10   :  { %912 = dma.done.wait [#allocation4], 512  }
  0x11   :  { %913 = vsyncadd [#allocation4], 4294966784 }
  0x12   :  { %914 = dma.done.wait [#allocation9], 4096  }
  0x13   :  { %915 = vsyncadd [#allocation9], 4294963200 }
  0x14   :  { %83 = sfence }
  0x15   :  { %v972_v0 = vld [vmem:[#allocation8 + $0x78] sm:$0xff]  ;;  %v974_v1 = vld [vmem:[#allocation8 + $0x70] sm:$0xff]  ;;  %s101_s1 = sld [smem:[#allocation3]]  ;;  %v980_v2 = vld [vmem:[#allocation8 + $0x68] sm:$0xff] }
  0x16   :  { %431 = vmatpush.msra.mxu0 %v972_v0  ;;  %s977_s4 = sld [smem:[#allocation3 + $0x1]]  ;;  %454 = vmatpush.msra.mxu1 %v972_v0  ;;  %v990_v3 = vld [vmem:[#allocation8 + $0x60] sm:$0xff]  ;;  %v1005_v5 = vld [vmem:[#allocation8 + $0x58] sm:$0xff]  ;;  %v1015_v7 = vld [vmem:[#allocation8 + $0x50] sm:$0xff] }
  0x17   :  { %s982_s16 = sld [smem:[#allocation3 + $0x2]]  ;;  %477 = vmatpush.msra.mxu2 %v972_v0  ;;  %500 = vmatpush.msra.mxu3 %v972_v0  ;;  %v1000_v4 = vld [vmem:[%s1239_s3] sm:$0x1]  ;;  %v1029_v12 = vld [vmem:[#allocation8 + $0x48] sm:$0xff]  ;;  %v1049_v22 = vld [vmem:[#allocation8 + $0x38] sm:$0xff] }
  0x18   :  { %432 = vmatpush.msra.mxu0 %v974_v1  ;;  %s987_s17 = sld [smem:[#allocation3 + $0x3]]  ;;  %455 = vmatpush.msra.mxu1 %v974_v1  ;;  %v1039_v17 = vld [vmem:[#allocation8 + $0x40] sm:$0xff]  ;;  %v1056_v25 = vld [vmem:[#allocation8 + $0x30] sm:$0xff]  ;;  %v1070_v31 = vld [vmem:[#allocation8 + $0x28] sm:$0xff] }
  0x19   :  { %s992_s18 = sld [smem:[#allocation3 + $0x4]]  ;;  %478 = vmatpush.msra.mxu2 %v974_v1  ;;  %501 = vmatpush.msra.mxu3 %v974_v1  ;;  %v1080_v32 = vld [vmem:[#allocation8 + $0x20] sm:$0xff]  ;;  %v1090_v33 = vld [vmem:[#allocation8 + $0x18] sm:$0xff]  ;;  %v1097_v35 = vld [vmem:[#allocation8 + $0x10] sm:$0xff] }
  0x1a   :  { %433 = vmatpush.msra.mxu0 %v980_v2  ;;  %s1002_s21 = sld [smem:[#allocation3 + $0x5]]  ;;  %456 = vmatpush.msra.mxu1 %v980_v2  ;;  %v1106_v41 = vld [vmem:[#allocation8 + $0x8] sm:$0xff]  ;;  %v1116_v46 = vld [vmem:[#allocation8] sm:$0xff] }
  0x1b   :  { %s1007_s22 = sld [smem:[#allocation3 + $0x6]]  ;;  %479 = vmatpush.msra.mxu2 %v980_v2  ;;  %502 = vmatpush.msra.mxu3 %v980_v2  ;;  %s102_s23 = scalar_lea.vmem [#allocation7], %s101_s1 }
  0x1c   :  { %434 = vmatpush.msra.mxu0 %v990_v3  ;;  %v103_v6 = vld [vmem:[%s102_s23] sm:$0x1]  ;;  %s1012_s24 = sld [smem:[#allocation3 + $0x7]]  ;;  %457 = vmatpush.msra.mxu1 %v990_v3  ;;  %s107_s3 = scalar_lea.vmem [#allocation7], %s977_s4 }
  0x1d   :  { %v104_v8 = vadd.f32 %v103_v6, %v1000_v4  ;;  %v108_v9 = vld [vmem:[%s107_s3] sm:$0x1]  ;;  %s1019_s25 = sld [smem:[#allocation3 + $0x80]]  ;;  %480 = vmatpush.msra.mxu2 %v990_v3  ;;  %503 = vmatpush.msra.mxu3 %v990_v3  ;;  %s112_s26 = scalar_lea.vmem [#allocation7], %s982_s16 }
  0x1e   :  { %435 = vmatpush.msra.mxu0 %v1005_v5  ;;  %v109_v10 = vadd.f32 %v108_v9, %v1000_v4  ;;  %v113_v11 = vld [vmem:[%s112_s26] sm:$0x1]  ;;  %458 = vmatpush.msra.mxu1 %v1005_v5  ;;  %s1027_s27 = sld [smem:[#allocation3 + $0x81]]  ;;  %s117_s28 = scalar_lea.vmem [#allocation7], %s987_s17 }
  0x1f   :  { %105 = vst [vmem:[#allocation2] sm:$0x1] %v104_v8  ;;  %v114_v13 = vadd.f32 %v113_v11, %v1000_v4  ;;  %v118_v14 = vld [vmem:[%s117_s28] sm:$0x1]  ;;  %481 = vmatpush.msra.mxu2 %v1005_v5  ;;  %504 = vmatpush.msra.mxu3 %v1005_v5  ;;  %s122_s29 = scalar_lea.vmem [#allocation7], %s992_s18  ;;  %s1063_s2 = sld [smem:[#allocation3 + $0x82]] }
  0x20   :  { %436 = vmatpush.msra.mxu0 %v1015_v7  ;;  %110 = vst [vmem:[#allocation2 + $0x1] sm:$0x1] %v109_v10  ;;  %v119_v15 = vadd.f32 %v118_v14, %v1000_v4  ;;  %v123_v16 = vld [vmem:[%s122_s29] sm:$0x1]  ;;  %459 = vmatpush.msra.mxu1 %v1015_v7  ;;  %s127_s30 = scalar_lea.vmem [#allocation7], %s1002_s21  ;;  %s725_s11 = sld [smem:[#allocation3 + $0x83]] }
  0x21   :  { %115 = vst [vmem:[#allocation2 + $0x2] sm:$0x1] %v114_v13  ;;  %v124_v18 = vadd.f32 %v123_v16, %v1000_v4  ;;  %v128_v19 = vld [vmem:[%s127_s30] sm:$0x1]  ;;  %482 = vmatpush.msra.mxu2 %v1015_v7  ;;  %505 = vmatpush.msra.mxu3 %v1015_v7  ;;  %s132_s7 = scalar_lea.vmem [#allocation7], %s1007_s22  ;;  %s1072_s12 = sld [smem:[#allocation3 + $0x84]] }
  0x22   :  { %437 = vmatpush.msra.mxu0 %v1029_v12  ;;  %120 = vst [vmem:[#allocation2 + $0x3] sm:$0x1] %v119_v15  ;;  %v129_v20 = vadd.f32 %v128_v19, %v1000_v4  ;;  %v133_v21 = vld [vmem:[%s132_s7] sm:$0x1]  ;;  %460 = vmatpush.msra.mxu1 %v1029_v12  ;;  %s137_s8 = scalar_lea.vmem [#allocation7], %s1012_s24  ;;  %s1078_s13 = sld [smem:[#allocation3 + $0x85]] }
  0x23   :  { %125 = vst [vmem:[#allocation2 + $0x4] sm:$0x1] %v124_v18  ;;  %v134_v23 = vadd.f32 %v133_v21, %v1000_v4  ;;  %v138_v24 = vld [vmem:[%s137_s8] sm:$0x1]  ;;  %483 = vmatpush.msra.mxu2 %v1029_v12  ;;  %506 = vmatpush.msra.mxu3 %v1029_v12  ;;  %s142_s9 = scalar_lea.vmem [#allocation7], %s1019_s25  ;;  %s1082_s14 = sld [smem:[#allocation3 + $0x86]] }
  0x24   :  { %438 = vmatpush.msra.mxu0 %v1039_v17  ;;  %130 = vst [vmem:[#allocation2 + $0x5] sm:$0x1] %v129_v20  ;;  %v139_v26 = vadd.f32 %v138_v24, %v1000_v4  ;;  %461 = vmatpush.msra.mxu1 %v1039_v17  ;;  %v143_v27 = vld [vmem:[%s142_s9] sm:$0x1]  ;;  %s148_s10 = scalar_lea.vmem [#allocation7], %s1027_s27  ;;  %s1088_s0 = sld [smem:[#allocation3 + $0x87]] }
  0x25   :  { %135 = vst [vmem:[#allocation2 + $0x6] sm:$0x1] %v134_v23  ;;  %v144_v28 = vadd.f32 %v143_v27, %v1000_v4  ;;  %v149_v29 = vld [vmem:[%s148_s10] sm:$0x1]  ;;  %484 = vmatpush.msra.mxu2 %v1039_v17  ;;  %507 = vmatpush.msra.mxu3 %v1039_v17  ;;  %s153_s15 = scalar_lea.vmem [#allocation7], %s1063_s2  ;;  %s730_s19 = sld [smem:[#allocation3 + $0x100]] }
  0x26   :  { %439 = vmatpush.msra.mxu0 %v1049_v22  ;;  %140 = vst [vmem:[#allocation2 + $0x7] sm:$0x1] %v139_v26  ;;  %462 = vmatpush.msra.mxu1 %v1049_v22  ;;  %v150_v30 = vadd.f32 %v149_v29, %v1000_v4  ;;  %v154_v34 = vld [vmem:[%s153_s15] sm:$0x1]  ;;  %s158_s1 = scalar_lea.vmem [#allocation7], %s725_s11  ;;  %s731_s20 = sld [smem:[#allocation3 + $0x101]] }
  0x27   :  { %146 = vst [vmem:[#allocation2 + $0x8] sm:$0x1] %v144_v28  ;;  %485 = vmatpush.msra.mxu2 %v1049_v22  ;;  %508 = vmatpush.msra.mxu3 %v1049_v22  ;;  %v155_v37 = vadd.f32 %v154_v34, %v1000_v4  ;;  %v159_v38 = vld [vmem:[%s158_s1] sm:$0x1]  ;;  %s163_s4 = scalar_lea.vmem [#allocation7], %s1072_s12  ;;  %s732_s21 = sld [smem:[#allocation3 + $0x102]] }
  0x28   :  { %440 = vmatpush.msra.mxu0 %v1056_v25  ;;  %463 = vmatpush.msra.mxu1 %v1056_v25  ;;  %151 = vst [vmem:[#allocation2 + $0x9] sm:$0x1] %v150_v30  ;;  %v160_v39 = vadd.f32 %v159_v38, %v1000_v4  ;;  %v164_v40 = vld [vmem:[%s163_s4] sm:$0x1]  ;;  %s168_s16 = scalar_lea.vmem [#allocation7], %s1078_s13  ;;  %s733_s22 = sld [smem:[#allocation3 + $0x103]] }
  0x29   :  { %486 = vmatpush.msra.mxu2 %v1056_v25  ;;  %509 = vmatpush.msra.mxu3 %v1056_v25  ;;  %156 = vst [vmem:[#allocation2 + $0xa] sm:$0x1] %v155_v37  ;;  %v165_v42 = vadd.f32 %v164_v40, %v1000_v4  ;;  %v169_v43 = vld [vmem:[%s168_s16] sm:$0x1]  ;;  %s173_s17 = scalar_lea.vmem [#allocation7], %s1082_s14  ;;  %s734_s23 = sld [smem:[#allocation3 + $0x104]] }
  0x2a   :  { %441 = vmatpush.msra.mxu0 %v1070_v31  ;;  %464 = vmatpush.msra.mxu1 %v1070_v31  ;;  %161 = vst [vmem:[#allocation2 + $0xb] sm:$0x1] %v160_v39  ;;  %v170_v44 = vadd.f32 %v169_v43, %v1000_v4  ;;  %v174_v45 = vld [vmem:[%s173_s17] sm:$0x1]  ;;  %s178_s18 = scalar_lea.vmem [#allocation7], %s1088_s0  ;;  %s735_s24 = sld [smem:[#allocation3 + $0x105]] }
  0x2b   :  { %487 = vmatpush.msra.mxu2 %v1070_v31  ;;  %510 = vmatpush.msra.mxu3 %v1070_v31  ;;  %166 = vst [vmem:[#allocation2 + $0xc] sm:$0x1] %v165_v42  ;;  %v175_v47 = vadd.f32 %v174_v45, %v1000_v4  ;;  %v179_v48 = vld [vmem:[%s178_s18] sm:$0x1]  ;;  %s736_s3 = sld [smem:[#allocation3 + $0x106]]  ;;  %s183_s26 = scalar_lea.vmem [#allocation7], %s730_s19 }
  0x2c   :  { %442 = vmatpush.msra.mxu0 %v1080_v32  ;;  %465 = vmatpush.msra.mxu1 %v1080_v32  ;;  %171 = vst [vmem:[#allocation2 + $0xd] sm:$0x1] %v170_v44  ;;  %v180_v49 = vadd.f32 %v179_v48, %v1000_v4  ;;  %s737_s25 = sld [smem:[#allocation3 + $0x107]]  ;;  %v184_v51 = vld [vmem:[%s183_s26] sm:$0x1]  ;;  %s189_s27 = scalar_lea.vmem [#allocation7], %s731_s20 }
  0x2d   :  { %v428_v36 = vld [vmem:[#allocation2] sm:$0xff]  ;;  %488 = vmatpush.msra.mxu2 %v1080_v32  ;;  %511 = vmatpush.msra.mxu3 %v1080_v32  ;;  %176 = vst [vmem:[#allocation2 + $0xe] sm:$0x1] %v175_v47  ;;  %s194_s28 = scalar_lea.vmem [#allocation7], %s732_s21  ;;  %v185_v54 = vadd.f32 %v184_v51, %v1000_v4  ;;  %s738_s10 = sld [smem:[#allocation3 + $0x180]] }
  0x2e   :  { %443 = vmatpush.msra.mxu0 %v1090_v33  ;;  %786 = vtanh.f32 %v428_v36  ;;  %466 = vmatpush.msra.mxu1 %v1090_v33  ;;  %181 = vst [vmem:[#allocation2 + $0xf] sm:$0x1] %v180_v49  ;;  %v190_v52 = vld [vmem:[%s189_s27] sm:$0x1]  ;;  %s199_s29 = scalar_lea.vmem [#allocation7], %s733_s22  ;;  %s739_s2 = sld [smem:[#allocation3 + $0x181]] }
  0x2f   :  { %489 = vmatpush.msra.mxu2 %v1090_v33  ;;  %512 = vmatpush.msra.mxu3 %v1090_v33  ;;  %v195_v53 = vld [vmem:[%s194_s28] sm:$0x1]  ;;  %v191_v55 = vadd.f32 %v190_v52, %v1000_v4  ;;  %s204_s30 = scalar_lea.vmem [#allocation7], %s734_s23  ;;  %187 = vst [vmem:[#allocation2 + $0x10] sm:$0x1] %v185_v54  ;;  %s740_s11 = sld [smem:[#allocation3 + $0x182]] }
  0x30   :  { %444 = vmatpush.msra.mxu0 %v1097_v35  ;;  %467 = vmatpush.msra.mxu1 %v1097_v35  ;;  %v196_v56 = vadd.f32 %v195_v53, %v1000_v4  ;;  %v200_v57 = vld [vmem:[%s199_s29] sm:$0x1]  ;;  %s209_s7 = scalar_lea.vmem [#allocation7], %s735_s24  ;;  %s741_s12 = sld [smem:[#allocation3 + $0x183]] }
  0x31   :  { %490 = vmatpush.msra.mxu2 %v1097_v35  ;;  %513 = vmatpush.msra.mxu3 %v1097_v35  ;;  %v205_v58 = vld [vmem:[%s204_s30] sm:$0x1]  ;;  %v201_v60 = vadd.f32 %v200_v57, %v1000_v4  ;;  %s214_s8 = scalar_lea.vmem [#allocation7], %s736_s3  ;;  %192 = vst [vmem:[#allocation2 + $0x11] sm:$0x1] %v191_v55  ;;  %s742_s13 = sld [smem:[#allocation3 + $0x184]] }
  0x32   :  { %445 = vmatpush.msra.mxu0 %v1106_v41  ;;  %468 = vmatpush.msra.mxu1 %v1106_v41  ;;  %v210_v59 = vld [vmem:[%s209_s7] sm:$0x1]  ;;  %v206_v62 = vadd.f32 %v205_v58, %v1000_v4  ;;  %s219_s9 = scalar_lea.vmem [#allocation7], %s737_s25  ;;  %197 = vst [vmem:[#allocation2 + $0x12] sm:$0x1] %v196_v56  ;;  %s743_s14 = sld [smem:[#allocation3 + $0x185]] }
  0x33   :  { %491 = vmatpush.msra.mxu2 %v1106_v41  ;;  %514 = vmatpush.msra.mxu3 %v1106_v41  ;;  %v215_v61 = vld [vmem:[%s214_s8] sm:$0x1]  ;;  %202 = vst [vmem:[#allocation2 + $0x13] sm:$0x1] %v201_v60  ;;  %s744_s0 = sld [smem:[#allocation3 + $0x186]]  ;;  %s224_s1 = scalar_lea.vmem [#allocation7], %s738_s10 }
  0x34   :  { %v787_v50 = vpop.eup %786  ;;  %446 = vmatpush.msra.mxu0 %v1116_v46  ;;  %469 = vmatpush.msra.mxu1 %v1116_v46  ;;  %v220_v63 = vld [vmem:[%s219_s9] sm:$0x1]  ;;  %207 = vst [vmem:[#allocation2 + $0x14] sm:$0x1] %v206_v62  ;;  %s745_s15 = sld [smem:[#allocation3 + $0x187]]  ;;  %s230_s4 = scalar_lea.vmem [#allocation7], %s739_s2 }
  0x35   :  { %447 = vmatmul.f32.vlgmr.msra.gmra.mxu0 %v787_v50  ;;  %492 = vmatpush.msra.mxu2 %v1116_v46  ;;  %v225_v8 = vld [vmem:[%s224_s1] sm:$0x1]  ;;  %s235_s16 = scalar_lea.vmem [#allocation7], %s740_s11  ;;  %s746_s22 = sld [smem:[#allocation3 + $0x200]] }
  0x36   :  { %515 = vmatpush.msra.mxu3 %v1116_v46  ;;  %523 = vmatpush.msrb.mxu0 %v972_v0  ;;  %v231_v9 = vld [vmem:[%s230_s4] sm:$0x1]  ;;  %v226_v11 = vadd.f32 %v225_v8, %v1000_v4  ;;  %s240_s17 = scalar_lea.vmem [#allocation7], %s741_s12  ;;  %s747_s23 = sld [smem:[#allocation3 + $0x201]] }
  0x37   :  { %546 = vmatpush.msrb.mxu1 %v972_v0  ;;  %569 = vmatpush.msrb.mxu2 %v972_v0  ;;  %v211_v0 = vadd.f32 %v210_v59, %v1000_v4  ;;  %v236_v10 = vld [vmem:[%s235_s16] sm:$0x1]  ;;  %s245_s18 = scalar_lea.vmem [#allocation7], %s742_s13  ;;  %s748_s24 = sld [smem:[#allocation3 + $0x202]] }
  0x38   :  { %524 = vmatpush.msrb.mxu0 %v974_v1  ;;  %v237_v13 = vadd.f32 %v236_v10, %v1000_v4  ;;  %v241_v14 = vld [vmem:[%s240_s17] sm:$0x1]  ;;  %s250_s19 = scalar_lea.vmem [#allocation7], %s743_s14  ;;  %228 = vst [vmem:[#allocation2 + $0x18] sm:$0x1] %v226_v11  ;;  %s749_s3 = sld [smem:[#allocation3 + $0x203]] }
  0x39   :  { %547 = vmatpush.msrb.mxu1 %v974_v1  ;;  %570 = vmatpush.msrb.mxu2 %v974_v1  ;;  %v216_v1 = vadd.f32 %v215_v61, %v1000_v4  ;;  %212 = vst [vmem:[#allocation2 + $0x15] sm:$0x1] %v211_v0  ;;  %v246_v15 = vld [vmem:[%s245_s18] sm:$0x1]  ;;  %s255_s20 = scalar_lea.vmem [#allocation7], %s744_s0  ;;  %s750_s25 = sld [smem:[#allocation3 + $0x204]] }
  0x3a   :  { %525 = vmatpush.msrb.mxu0 %v980_v2  ;;  %v251_v16 = vld [vmem:[%s250_s19] sm:$0x1]  ;;  %v247_v19 = vadd.f32 %v246_v15, %v1000_v4  ;;  %s260_s21 = scalar_lea.vmem [#allocation7], %s745_s15  ;;  %238 = vst [vmem:[#allocation2 + $0x1a] sm:$0x1] %v237_v13  ;;  %s751_s26 = sld [smem:[#allocation3 + $0x205]] }
  0x3b   :  { %548 = vmatpush.msrb.mxu1 %v980_v2  ;;  %571 = vmatpush.msrb.mxu2 %v980_v2  ;;  %v221_v2 = vadd.f32 %v220_v63, %v1000_v4  ;;  %217 = vst [vmem:[#allocation2 + $0x16] sm:$0x1] %v216_v1  ;;  %v256_v18 = vld [vmem:[%s255_s20] sm:$0x1]  ;;  %v252_v21 = vadd.f32 %v251_v16, %v1000_v4  ;;  %s752_s27 = sld [smem:[#allocation3 + $0x206]]  ;;  %s265_s29 = scalar_lea.vmem [#allocation7], %s746_s22 }
  0x3c   :  { %526 = vmatpush.msrb.mxu0 %v990_v3  ;;  %v261_v20 = vld [vmem:[%s260_s21] sm:$0x1]  ;;  %248 = vst [vmem:[#allocation2 + $0x1c] sm:$0x1] %v247_v19  ;;  %s753_s28 = sld [smem:[#allocation3 + $0x207]]  ;;  %s271_s30 = scalar_lea.vmem [#allocation7], %s747_s23 }
  0x3d   :  { %549 = vmatpush.msrb.mxu1 %v990_v3  ;;  %572 = vmatpush.msrb.mxu2 %v990_v3  ;;  %222 = vst [vmem:[#allocation2 + $0x17] sm:$0x1] %v221_v2  ;;  %v430_v3 = vld [vmem:[#allocation2 + $0x8] sm:$0xff]  ;;  %v262_v23 = vadd.f32 %v261_v20, %v1000_v4  ;;  %v266_v28 = vld [vmem:[%s265_s29] sm:$0x1]  ;;  %s276_s7 = scalar_lea.vmem [#allocation7], %s748_s24 }
  0x3e   :  { %527 = vmatpush.msrb.mxu0 %v1005_v5  ;;  %253 = vst [vmem:[#allocation2 + $0x1d] sm:$0x1] %v252_v21  ;;  %v272_v29 = vld [vmem:[%s271_s30] sm:$0x1]  ;;  %s281_s8 = scalar_lea.vmem [#allocation7], %s749_s3  ;;  %s754_s12 = sld [smem:[#allocation3 + $0x280]] }
  0x3f   :  { %550 = vmatpush.msrb.mxu1 %v1005_v5  ;;  %573 = vmatpush.msrb.mxu2 %v1005_v5  ;;  %263 = vst [vmem:[#allocation2 + $0x1f] sm:$0x1] %v262_v23  ;;  %v277_v30 = vld [vmem:[%s276_s7] sm:$0x1]  ;;  %s286_s9 = scalar_lea.vmem [#allocation7], %s750_s25  ;;  %s755_s13 = sld [smem:[#allocation3 + $0x281]] }
  0x40   :  { %528 = vmatpush.msrb.mxu0 %v1015_v7  ;;  %v282_v34 = vld [vmem:[%s281_s8] sm:$0x1]  ;;  %s291_s10 = scalar_lea.vmem [#allocation7], %s751_s26  ;;  %s756_s14 = sld [smem:[#allocation3 + $0x282]] }
  0x41   :  { %551 = vmatpush.msrb.mxu1 %v1015_v7  ;;  %574 = vmatpush.msrb.mxu2 %v1015_v7  ;;  %v292_v36 = vld [vmem:[%s291_s10] sm:$0x1]  ;;  %v283_v37 = vadd.f32 %v282_v34, %v1000_v4  ;;  %s296_s2 = scalar_lea.vmem [#allocation7], %s752_s27  ;;  %s757_s0 = sld [smem:[#allocation3 + $0x283]] }
  0x42   :  { %529 = vmatpush.msrb.mxu0 %v1029_v12  ;;  %v297_v38 = vld [vmem:[%s296_s2] sm:$0x1]  ;;  %s301_s11 = scalar_lea.vmem [#allocation7], %s753_s28  ;;  %s758_s15 = sld [smem:[#allocation3 + $0x284]] }
  0x43   :  { %552 = vmatpush.msrb.mxu1 %v1029_v12  ;;  %575 = vmatpush.msrb.mxu2 %v1029_v12  ;;  %v232_v12 = vadd.f32 %v231_v9, %v1000_v4  ;;  %v302_v40 = vld [vmem:[%s301_s11] sm:$0x1]  ;;  %v298_v42 = vadd.f32 %v297_v38, %v1000_v4  ;;  %284 = vst [vmem:[#allocation2 + $0x23] sm:$0x1] %v283_v37  ;;  %s759_s1 = sld [smem:[#allocation3 + $0x285]] }
  0x44   :  { %530 = vmatpush.msrb.mxu0 %v1039_v17  ;;  %v453_v24 = vld [vmem:[#allocation2 + $0x10] sm:$0xff]  ;;  %v303_v43 = vadd.f32 %v302_v40, %v1000_v4  ;;  %s760_s4 = sld [smem:[#allocation3 + $0x286]]  ;;  %s306_s17 = scalar_lea.vmem [#allocation7], %s754_s12  ;;  %v602_v40 = vld [vmem:[#allocation10 + $0x58] sm:$0xff] }
  0x45   :  { %553 = vmatpush.msrb.mxu1 %v1039_v17  ;;  %576 = vmatpush.msrb.mxu2 %v1039_v17  ;;  %v242_v17 = vadd.f32 %v241_v14, %v1000_v4  ;;  %233 = vst [vmem:[#allocation2 + $0x19] sm:$0x1] %v232_v12  ;;  %s761_s16 = sld [smem:[#allocation3 + $0x287]]  ;;  %v307_v48 = vld [vmem:[%s306_s17] sm:$0x1]  ;;  %s312_s18 = scalar_lea.vmem [#allocation7], %s755_s13 }
  0x46   :  { %531 = vmatpush.msrb.mxu0 %v1049_v22  ;;  %299 = vst [vmem:[#allocation2 + $0x26] sm:$0x1] %v298_v42  ;;  %v313_v49 = vld [vmem:[%s312_s18] sm:$0x1]  ;;  %s317_s19 = scalar_lea.vmem [#allocation7], %s756_s14  ;;  %v308_v51 = vadd.f32 %v307_v48, %v1000_v4  ;;  %s762_s3 = sld [smem:[#allocation3 + $0x300]] }
  0x47   :  { %554 = vmatpush.msrb.mxu1 %v1049_v22  ;;  %577 = vmatpush.msrb.mxu2 %v1049_v22  ;;  %v257_v22 = vadd.f32 %v256_v18, %v1000_v4  ;;  %243 = vst [vmem:[#allocation2 + $0x1b] sm:$0x1] %v242_v17  ;;  %v318_v50 = vld [vmem:[%s317_s19] sm:$0x1]  ;;  %v314_v52 = vadd.f32 %v313_v49, %v1000_v4  ;;  %s322_s20 = scalar_lea.vmem [#allocation7], %s757_s0  ;;  %s763_s25 = sld [smem:[#allocation3 + $0x301]] }
  0x48   :  { %532 = vmatpush.msrb.mxu0 %v1056_v25  ;;  %304 = vst [vmem:[#allocation2 + $0x27] sm:$0x1] %v303_v43  ;;  %v319_v53 = vadd.f32 %v318_v50, %v1000_v4  ;;  %v323_v54 = vld [vmem:[%s322_s20] sm:$0x1]  ;;  %s327_s21 = scalar_lea.vmem [#allocation7], %s758_s15  ;;  %s764_s26 = sld [smem:[#allocation3 + $0x302]] }
  0x49   :  { %555 = vmatpush.msrb.mxu1 %v1056_v25  ;;  %578 = vmatpush.msrb.mxu2 %v1056_v25  ;;  %258 = vst [vmem:[#allocation2 + $0x1e] sm:$0x1] %v257_v22  ;;  %v328_v55 = vld [vmem:[%s327_s21] sm:$0x1]  ;;  %s332_s22 = scalar_lea.vmem [#allocation7], %s759_s1  ;;  %v324_v57 = vadd.f32 %v323_v54, %v1000_v4  ;;  %s765_s27 = sld [smem:[#allocation3 + $0x303]] }
  0x4a   :  { %533 = vmatpush.msrb.mxu0 %v1070_v31  ;;  %v333_v56 = vld [vmem:[%s332_s22] sm:$0x1]  ;;  %s337_s23 = scalar_lea.vmem [#allocation7], %s760_s4  ;;  %310 = vst [vmem:[#allocation2 + $0x28] sm:$0x1] %v308_v51  ;;  %v329_v59 = vadd.f32 %v328_v55, %v1000_v4  ;;  %s766_s28 = sld [smem:[#allocation3 + $0x304]] }
  0x4b   :  { %556 = vmatpush.msrb.mxu1 %v1070_v31  ;;  %579 = vmatpush.msrb.mxu2 %v1070_v31  ;;  %v267_v31 = vadd.f32 %v266_v28, %v1000_v4  ;;  %v338_v58 = vld [vmem:[%s337_s23] sm:$0x1]  ;;  %s342_s24 = scalar_lea.vmem [#allocation7], %s761_s16  ;;  %315 = vst [vmem:[#allocation2 + $0x29] sm:$0x1] %v314_v52  ;;  %v334_v61 = vadd.f32 %v333_v56, %v1000_v4  ;;  %s767_s29 = sld [smem:[#allocation3 + $0x305]] }
  0x4c   :  { %534 = vmatpush.msrb.mxu0 %v1080_v32  ;;  %v343_v60 = vld [vmem:[%s342_s24] sm:$0x1]  ;;  %320 = vst [vmem:[#allocation2 + $0x2a] sm:$0x1] %v319_v53  ;;  %v339_v62 = vadd.f32 %v338_v58, %v1000_v4  ;;  %s768_s30 = sld [smem:[#allocation3 + $0x306]]  ;;  %s347_s8 = scalar_lea.vmem [#allocation7], %s762_s3 }
  0x4d   :  { %557 = vmatpush.msrb.mxu1 %v1080_v32  ;;  %580 = vmatpush.msrb.mxu2 %v1080_v32  ;;  %v273_v32 = vadd.f32 %v272_v29, %v1000_v4  ;;  %269 = vst [vmem:[#allocation2 + $0x20] sm:$0x1] %v267_v31  ;;  %v344_v63 = vadd.f32 %v343_v60, %v1000_v4  ;;  %s769_s7 = sld [smem:[#allocation3 + $0x307]]  ;;  %v603_v28 = vld [vmem:[#allocation10 + $0x60] sm:$0xff]  ;;  %v598_v49 = vld [vmem:[#allocation10 + $0x38] sm:$0xff]  ;;  %v597_v50 = vld [vmem:[#allocation10 + $0x30] sm:$0xff] }
  0x4e   :  { %535 = vmatpush.msrb.mxu0 %v1090_v33  ;;  %325 = vst [vmem:[#allocation2 + $0x2b] sm:$0x1] %v324_v57  ;;  %s358_s10 = scalar_lea.vmem [#allocation7], %s764_s26  ;;  %s770_s0 = sld [smem:[#allocation3 + $0x380]]  ;;  %v599_v48 = vld [vmem:[#allocation10 + $0x40] sm:$0xff]  ;;  %v596_v51 = vld [vmem:[#allocation10 + $0x28] sm:$0xff] }
  0x4f   :  { %558 = vmatpush.msrb.mxu1 %v1090_v33  ;;  %581 = vmatpush.msrb.mxu2 %v1090_v33  ;;  %v278_v33 = vadd.f32 %v277_v30, %v1000_v4  ;;  %274 = vst [vmem:[#allocation2 + $0x21] sm:$0x1] %v273_v32  ;;  %s363_s2 = scalar_lea.vmem [#allocation7], %s765_s27  ;;  %s771_s15 = sld [smem:[#allocation3 + $0x381]]  ;;  %v595_v55 = vld [vmem:[#allocation10 + $0x20] sm:$0xff]  ;;  %v594_v56 = vld [vmem:[#allocation10 + $0x18] sm:$0xff] }
  0x50   :  { %536 = vmatpush.msrb.mxu0 %v1097_v35  ;;  %v476_v44 = vld [vmem:[#allocation2 + $0x18] sm:$0xff]  ;;  %330 = vst [vmem:[#allocation2 + $0x2c] sm:$0x1] %v329_v59  ;;  %v364_v11 = vld [vmem:[%s363_s2] sm:$0x1]  ;;  %s368_s11 = scalar_lea.vmem [#allocation7], %s766_s28 }
  0x51   :  { %559 = vmatpush.msrb.mxu1 %v1097_v35  ;;  %582 = vmatpush.msrb.mxu2 %v1097_v35  ;;  %v287_v35 = vld [vmem:[%s286_s9] sm:$0x1]  ;;  %279 = vst [vmem:[#allocation2 + $0x22] sm:$0x1] %v278_v33  ;;  %s353_s9 = scalar_lea.vmem [#allocation7], %s763_s25  ;;  %s373_s12 = scalar_lea.vmem [#allocation7], %s767_s29  ;;  %v365_v14 = vadd.f32 %v364_v11, %v1000_v4 }
  0x52   :  { %537 = vmatpush.msrb.mxu0 %v1106_v41  ;;  %v288_v39 = vadd.f32 %v287_v35, %v1000_v4  ;;  %335 = vst [vmem:[#allocation2 + $0x2d] sm:$0x1] %v334_v61  ;;  %v369_v12 = vld [vmem:[%s368_s11] sm:$0x1]  ;;  %s378_s13 = scalar_lea.vmem [#allocation7], %s768_s30  ;;  %s772_s1 = sld [smem:[#allocation3 + $0x382]] }
  0x53   :  { %560 = vmatpush.msrb.mxu1 %v1106_v41  ;;  %583 = vmatpush.msrb.mxu2 %v1106_v41  ;;  %v293_v41 = vadd.f32 %v292_v36, %v1000_v4  ;;  %340 = vst [vmem:[#allocation2 + $0x2e] sm:$0x1] %v339_v62  ;;  %v374_v13 = vld [vmem:[%s373_s12] sm:$0x1]  ;;  %v370_v16 = vadd.f32 %v369_v12, %v1000_v4  ;;  %s383_s14 = scalar_lea.vmem [#allocation7], %s769_s7  ;;  %s773_s4 = sld [smem:[#allocation3 + $0x383]] }
  0x54   :  { %538 = vmatpush.msrb.mxu0 %v1116_v46  ;;  %289 = vst [vmem:[#allocation2 + $0x24] sm:$0x1] %v288_v39  ;;  %v379_v15 = vld [vmem:[%s378_s13] sm:$0x1]  ;;  %v375_v18 = vadd.f32 %v374_v13, %v1000_v4  ;;  %s774_s16 = sld [smem:[#allocation3 + $0x384]]  ;;  %s388_s20 = scalar_lea.vmem [#allocation7], %s770_s0 }
  0x55   :  { %561 = vmatpush.msrb.mxu1 %v1116_v46  ;;  %584 = vmatpush.msrb.mxu2 %v1116_v46  ;;  %294 = vst [vmem:[#allocation2 + $0x25] sm:$0x1] %v293_v41  ;;  %v384_v17 = vld [vmem:[%s383_s14] sm:$0x1]  ;;  %v380_v19 = vadd.f32 %v379_v15, %v1000_v4  ;;  %s775_s17 = sld [smem:[#allocation3 + $0x385]]  ;;  %s394_s21 = scalar_lea.vmem [#allocation7], %s771_s15 }
  0x56   :  { %345 = vst [vmem:[#allocation2 + $0x2f] sm:$0x1] %v344_v63  ;;  %v385_v20 = vadd.f32 %v384_v17, %v1000_v4  ;;  %s776_s18 = sld [smem:[#allocation3 + $0x386]]  ;;  %v389_v29 = vld [vmem:[%s388_s20] sm:$0x1]  ;;  %v593_v57 = vld [vmem:[#allocation10 + $0x10] sm:$0xff] }
  0x57   :  { %366 = vst [vmem:[#allocation2 + $0x33] sm:$0x1] %v365_v14  ;;  %s1219_s19 = sld [smem:[#allocation3 + $0x387]]  ;;  %v390_v30 = vadd.f32 %v389_v29, %v1000_v4  ;;  %v395_v31 = vld [vmem:[%s394_s21] sm:$0x1]  ;;  %v592_v58 = vld [vmem:[#allocation10 + $0x8] sm:$0xff] }
  0x58   :  { %371 = vst [vmem:[#allocation2 + $0x34] sm:$0x1] %v370_v16  ;;  %s399_s22 = scalar_lea.vmem [#allocation7], %s772_s1  ;;  %v396_v34 = vadd.f32 %v395_v31, %v1000_v4  ;;  %v591_v59 = vld [vmem:[#allocation10] sm:$0xff]  ;;  %s924_s29 = smov [#allocation11]  }
  0x59   :  { %376 = vst [vmem:[#allocation2 + $0x35] sm:$0x1] %v375_v18  ;;  %v400_v32 = vld [vmem:[%s399_s22] sm:$0x1]  ;;  %s404_s23 = scalar_lea.vmem [#allocation7], %s773_s4  ;;  %s637_s30 = sshll.u32 %s924_s29, 4  ;;  %s638_s30 = int_to_ptr.vmem [resolvable:$true] %s637_s30 }
  0x5a   :  { %381 = vst [vmem:[#allocation2 + $0x36] sm:$0x1] %v380_v19  ;;  %v405_v33 = vld [vmem:[%s404_s23] sm:$0x1]  ;;  %v401_v35 = vadd.f32 %v400_v32, %v1000_v4  ;;  %s409_s24 = scalar_lea.vmem [#allocation7], %s774_s16 }
  0x5b   :  { %386 = vst [vmem:[#allocation2 + $0x37] sm:$0x1] %v385_v20  ;;  %v406_v36 = vadd.f32 %v405_v33, %v1000_v4  ;;  %v410_v37 = vld [vmem:[%s409_s24] sm:$0x1]  ;;  %s414_s3 = scalar_lea.vmem [#allocation7], %s775_s17 }
  0x5c   :  { %v499_v0 = vld [vmem:[#allocation2 + $0x20] sm:$0xff]  ;;  %s419_s25 = scalar_lea.vmem [#allocation7], %s776_s18  ;;  %392 = vst [vmem:[#allocation2 + $0x38] sm:$0x1] %v390_v30  ;;  %v411_v41 = vadd.f32 %v410_v37, %v1000_v4 }
  0x5d   :  { %v522_v21 = vld [vmem:[#allocation2 + $0x28] sm:$0xff]  ;;  %v415_v38 = vld [vmem:[%s414_s3] sm:$0x1]  ;;  %s424_s26 = scalar_lea.vmem [#allocation7], %s1219_s19  ;;  %397 = vst [vmem:[#allocation2 + $0x39] sm:$0x1] %v396_v34 }
  0x5e   :  { %v420_v39 = vld [vmem:[%s419_s25] sm:$0x1]  ;;  %v416_v43 = vadd.f32 %v415_v38, %v1000_v4  ;;  %402 = vst [vmem:[#allocation2 + $0x3a] sm:$0x1] %v401_v35 }
  0x5f   :  { %v425_v42 = vld [vmem:[%s424_s26] sm:$0x1]  ;;  %407 = vst [vmem:[#allocation2 + $0x3b] sm:$0x1] %v406_v36 }
  0x60   :  { %412 = vst [vmem:[#allocation2 + $0x3c] sm:$0x1] %v411_v41 }
  0x61   :  { %417 = vst [vmem:[#allocation2 + $0x3d] sm:$0x1] %v416_v43 }
  0xb2   :  { %v448_v5 = vpop.f32.mrf.mxu0 }
  0xb3   :  { %v451_v6 = vadd.f32 %v448_v5, %v430_v3  ;;  %v348_v5 = vld [vmem:[%s347_s8] sm:$0x1] }
  0xb4   :  { %v349_v8 = vadd.f32 %v348_v5, %v1000_v4 }
  0xb5   :  { %788 = vtanh.f32 %v451_v6  ;;  %v354_v6 = vld [vmem:[%s353_s9] sm:$0x1]  ;;  %s639_s9 = sshll.u32 %s1242_s6, 4  ;;  %s640_s9 = int_to_ptr.hbm [resolvable:$true] %s639_s9 }
  0xb6   :  { %v355_v9 = vadd.f32 %v354_v6, %v1000_v4  ;;  %351 = vst [vmem:[#allocation2 + $0x30] sm:$0x1] %v349_v8 }
  0xb8   :  { %356 = vst [vmem:[#allocation2 + $0x31] sm:$0x1] %v355_v9 }
  0xbb   :  { %v789_v7 = vpop.eup %788 }
  0xbc   :  { %470 = vmatmul.f32.vlgmr.msra.gmra.mxu1 %v789_v7  ;;  %v359_v7 = vld [vmem:[%s358_s10] sm:$0x1] }
  0xbd   :  { %v360_v10 = vadd.f32 %v359_v7, %v1000_v4 }
  0xbf   :  { %361 = vst [vmem:[#allocation2 + $0x32] sm:$0x1] %v360_v10 }
  0xc6   :  { %v545_v52 = vld [vmem:[#allocation2 + $0x30] sm:$0xff] }
 0x139   :  { %v471_v25 = vpop.f32.mrf.mxu1 }
 0x13a   :  { %v474_v26 = vadd.f32 %v471_v25, %v453_v24  ;;  %v606_v25 = vld [vmem:[#allocation10 + $0x78] sm:$0xff] }
 0x13b   :  { %611 = vmatpush.msrb.mxu3 %v606_v25 }
 0x13c   :  { %790 = vtanh.f32 %v474_v26  ;;  %v605_v26 = vld [vmem:[#allocation10 + $0x70] sm:$0xff] }
 0x13d   :  { %612 = vmatpush.msrb.mxu3 %v605_v26 }
 0x142   :  { %v791_v27 = vpop.eup %790 }
 0x143   :  { %493 = vmatmul.f32.vlgmr.msra.gmra.mxu2 %v791_v27  ;;  %v604_v27 = vld [vmem:[#allocation10 + $0x68] sm:$0xff] }
 0x144   :  { %613 = vmatpush.msrb.mxu3 %v604_v27 }
 0x146   :  { %614 = vmatpush.msrb.mxu3 %v603_v28 }
 0x148   :  { %615 = vmatpush.msrb.mxu3 %v602_v40 }
 0x1c6   :  { %v494_v45 = vpop.f32.mrf.mxu2 }
 0x1c7   :  { %v497_v46 = vadd.f32 %v494_v45, %v476_v44  ;;  %v601_v44 = vld [vmem:[#allocation10 + $0x50] sm:$0xff]  ;;  %v421_v45 = vadd.f32 %v420_v39, %v1000_v4 }
 0x1c8   :  { %616 = vmatpush.msrb.mxu3 %v601_v44 }
 0x1c9   :  { %792 = vtanh.f32 %v497_v46  ;;  %v426_v46 = vadd.f32 %v425_v42, %v1000_v4  ;;  %422 = vst [vmem:[#allocation2 + $0x3e] sm:$0x1] %v421_v45 }
 0x1cb   :  { %427 = vst [vmem:[#allocation2 + $0x3f] sm:$0x1] %v426_v46 }
 0x1cf   :  { %v793_v47 = vpop.eup %792 }
 0x1d0   :  { %516 = vmatmul.f32.vlgmr.msra.gmra.mxu3 %v793_v47  ;;  %v600_v47 = vld [vmem:[#allocation10 + $0x48] sm:$0xff] }
 0x1d1   :  { %617 = vmatpush.msrb.mxu3 %v600_v47 }
 0x1d2   :  { %v568_v60 = vld [vmem:[#allocation2 + $0x38] sm:$0xff] }
 0x1d3   :  { %618 = vmatpush.msrb.mxu3 %v599_v48 }
 0x1d5   :  { %619 = vmatpush.msrb.mxu3 %v598_v49 }
 0x1d7   :  { %620 = vmatpush.msrb.mxu3 %v597_v50 }
 0x1d9   :  { %621 = vmatpush.msrb.mxu3 %v596_v51 }
 0x1db   :  { %622 = vmatpush.msrb.mxu3 %v595_v55 }
 0x1dd   :  { %623 = vmatpush.msrb.mxu3 %v594_v56 }
 0x1df   :  { %624 = vmatpush.msrb.mxu3 %v593_v57 }
 0x1e1   :  { %625 = vmatpush.msrb.mxu3 %v592_v58 }
 0x1e3   :  { %626 = vmatpush.msrb.mxu3 %v591_v59 }
 0x253   :  { %v517_v1 = vpop.f32.mrf.mxu3 }
 0x254   :  { %v520_v2 = vadd.f32 %v517_v1, %v499_v0  ;;  %v785_v0 = vld [vmem:[%s1241_s5] ss:$0 sm:$0xff] }
 0x256   :  { %794 = vtanh.f32 %v520_v2 }
 0x25c   :  { %v795_v3 = vpop.eup %794 }
 0x25d   :  { %539 = vmatmul.f32.vlgmr.msrb.gmra.mxu0 %v795_v3 }
 0x2da   :  { %v540_v22 = vpop.f32.mrf.mxu0 }
 0x2db   :  { %v543_v23 = vadd.f32 %v540_v22, %v522_v21 }
 0x2dd   :  { %796 = vtanh.f32 %v543_v23 }
 0x2e3   :  { %v797_v24 = vpop.eup %796 }
 0x2e4   :  { %562 = vmatmul.f32.vlgmr.msrb.gmra.mxu1 %v797_v24 }
 0x361   :  { %v563_v53 = vpop.f32.mrf.mxu1 }
 0x362   :  { %v566_v54 = vadd.f32 %v563_v53, %v545_v52 }
 0x364   :  { %798 = vtanh.f32 %v566_v54 }
 0x36a   :  { %v799_v4 = vpop.eup %798 }
 0x36b   :  { %585 = vmatmul.f32.vlgmr.msrb.gmra.mxu2 %v799_v4 }
 0x3ee   :  { %v586_v61 = vpop.f32.mrf.mxu2 }
 0x3ef   :  { %v589_v62 = vadd.f32 %v586_v61, %v568_v60 }
 0x3f1   :  { %800 = vtanh.f32 %v589_v62 }
 0x3f7   :  { %v801_v63 = vpop.eup %800 }
 0x3f8   :  { %627 = vmatmul.f32.vlgmr.msrb.gmra.mxu3 %v801_v63 }
 0x47b   :  { %v628_v1 = vpop.f32.mrf.mxu3 }
 0x47c   :  { %v629_v2 = vadd.f32 %v785_v0, %v628_v1 }
 0x47e   :  { %631 = vst [vmem:[#allocation11] sm:$0xff] %v629_v2 }
 0x47f   :  { %642 = dma.vmem_to_hbm [thread:$0]  %s638_s30, 128, %s640_s9, [#allocation5]  }
 0x480   :  { %916 = dma.done.wait [#allocation5], 128  }
 0x481   :  { %917 = vsyncadd [#allocation5], 4294967168 }
 0x482   :  { %647 = vsyncpa [#allocation4], 1 }
 0x483   :  { %648 = vsyncpa [#allocation9], 1 }
 0x484   :  { %649 = vsyncpa [#allocation5], 1 }
 0x485   :  { %650 = vsyncpa [#allocation6], 1 }

</bundles_post_ra>
